<compile_context>
chip_gen: v5e
topology: v5e:2x2
jax: 0.10.0
libtpu: 0.0.40
codegen_flags: <defaults>
</compile_context>

<pallas_src>
import functools

import jax
import jax.numpy as jnp
from jax import lax
from jax.experimental import pallas as pl
from jax.experimental.pallas import tpu as pltpu


# Geometry fixed by the PyTorch module: fc1.in_features == 64 == C2*1*1 forces
# a 12x12 input (12 ->conv 10 ->pool 5 ->conv 3 ->pool 1).
IN_H = IN_W = 12
IN_C = 3
C1 = 32            # conv1 out channels
C2 = 64            # conv2 out channels
K = 3              # conv kernel size
H1 = IN_H - K + 1  # 10  (conv1 output spatial)
P1 = H1 // 2       # 5   (pool1 output spatial)
H2 = P1 - K + 1    # 3   (conv2 output spatial)
FC1_OUT = 32
N_CLASSES = 10
BATCH_TILE = 8     # images per grid step (multiple of 8 sublanes)


# ------------------------------ fused kernel --------------------------------

def _bpmnet_kernel(x_ref, w1_ref, b1_ref, w2_ref, b2_ref,
                   f1w_ref, f1b_ref, f2w_ref, f2b_ref,
                   o_ref, pool1_ref):
    # Weights / biases: loaded once per grid step, VMEM-resident.
    w1 = w1_ref[...]      # (K*K*IN_C, C1) = (27, 32), rows ordered (kh, kw, ic)
    b1 = b1_ref[...]      # (1, C1)
    w2 = w2_ref[...]      # (K*K*C1, C2)   = (288, 64)
    b2 = b2_ref[...]      # (1, C2)
    f1w = f1w_ref[...]    # (C2, FC1_OUT)
    f1b = f1b_ref[...]    # (1, FC1_OUT)
    f2w = f2w_ref[...]    # (FC1_OUT, N_CLASSES)
    f2b = f2b_ref[...]    # (1, N_CLASSES)

    def per_image(b, carry):
        # ---------------- conv1 + ReLU (implicit im2col) --------------------
        x2 = x_ref[b]                                    # (IN_H*IN_W, IN_C)
        # One matmul per kernel tap over all 144 pixels; conv output rows are
        # sums of shifted contiguous row-slices of these tap products.
        taps1 = [
            jnp.dot(x2, w1[IN_C * t:IN_C * (t + 1), :],
                    preferred_element_type=jnp.float32)
            for t in range(K * K)
        ]                                                # each (144, C1)
        conv1_rows = []
        for oh in range(H1):
            acc = None
            for kh in range(K):
                for kw in range(K):
                    base = (oh + kh) * IN_W + kw
                    s = taps1[K * kh + kw][base:base + H1, :]
                    acc = s if acc is None else acc + s
            conv1_rows.append(jnp.maximum(acc + b1, 0.0))   # (H1, C1)

        # ---------------- maxpool1 (2x2, stride 2) --> scratch --------------
        for ph in range(P1):
            m = jnp.maximum(conv1_rows[2 * ph], conv1_rows[2 * ph + 1])
            for pw in range(P1):
                r = P1 * ph + pw
                pool1_ref[r:r + 1, :] = jnp.maximum(
                    m[2 * pw:2 * pw + 1, :], m[2 * pw + 1:2 * pw + 2, :])
        pooled1 = pool1_ref[...]                          # (P1*P1, C1) = (25, 32)

        # ---------------- conv2 + ReLU (implicit im2col) --------------------
        taps2 = [
            jnp.dot(pooled1, w2[C1 * t:C1 * (t + 1), :],
                    preferred_element_type=jnp.float32)
            for t in range(K * K)
        ]                                                 # each (25, C2)
        conv2_rows = []
        for oh in range(H2):
            acc = None
            for kh in range(K):
                for kw in range(K):
                    base = (oh + kh) * P1 + kw
                    s = taps2[K * kh + kw][base:base + H2, :]
                    acc = s if acc is None else acc + s
            conv2_rows.append(jnp.maximum(acc + b2, 0.0))   # (H2, C2)

        # ---------------- maxpool2 (2x2, floor: 3x3 -> 1x1) -----------------
        m2 = jnp.maximum(conv2_rows[0][0:2, :], conv2_rows[1][0:2, :])  # (2, C2)
        feat = jnp.maximum(m2[0:1, :], m2[1:2, :])                      # (1, C2)

        # ---------------- fc1 -> ReLU -> fc2 -> log_softmax -----------------
        h = jnp.maximum(
            jnp.dot(feat, f1w, preferred_element_type=jnp.float32) + f1b, 0.0)
        logits = jnp.dot(h, f2w, preferred_element_type=jnp.float32) + f2b
        mx = jnp.max(logits, axis=-1, keepdims=True)
        sh = logits - mx
        lse = jnp.log(jnp.sum(jnp.exp(sh), axis=-1, keepdims=True))
        o_ref[pl.ds(b, 1), :] = sh - lse
        return carry

    lax.fori_loop(0, x_ref.shape[0], per_image, 0)


# --------------------------------- wrapper ----------------------------------

@jax.jit
def bpmnet_forward(x_nchw, params):
    n = x_nchw.shape[0]
    x = jnp.transpose(x_nchw, (0, 2, 3, 1)).astype(jnp.float32)   # NCHW -> NHWC
    x = x.reshape(n, IN_H * IN_W, IN_C)                           # (N, 144, 3)
    n_pad = ((n + BATCH_TILE - 1) // BATCH_TILE) * BATCH_TILE
    if n_pad != n:
        x = jnp.pad(x, ((0, n_pad - n), (0, 0), (0, 0)))

    w1 = params["w1"].reshape(K * K * IN_C, C1)     # HWIO -> (27, 32)
    w2 = params["w2"].reshape(K * K * C1, C2)       # HWIO -> (288, 64)
    b1 = params["b1"].reshape(1, C1)
    b2 = params["b2"].reshape(1, C2)
    f1w = params["fc1_w"]
    f1b = params["fc1_b"].reshape(1, FC1_OUT)
    f2w = params["fc2_w"]
    f2b = params["fc2_b"].reshape(1, N_CLASSES)

    def fixed(shape):
        return pl.BlockSpec(shape, lambda i: (0,) * len(shape))

    out = pl.pallas_call(
        _bpmnet_kernel,
        out_shape=jax.ShapeDtypeStruct((n_pad, N_CLASSES), jnp.float32),
        grid_spec=pltpu.PrefetchScalarGridSpec(
            num_scalar_prefetch=0,
            grid=(n_pad // BATCH_TILE,),
            in_specs=[
                pl.BlockSpec((BATCH_TILE, IN_H * IN_W, IN_C),
                             lambda i: (i, 0, 0)),
                fixed(w1.shape), fixed(b1.shape),
                fixed(w2.shape), fixed(b2.shape),
                fixed(f1w.shape), fixed(f1b.shape),
                fixed(f2w.shape), fixed(f2b.shape),
            ],
            out_specs=pl.BlockSpec((BATCH_TILE, N_CLASSES), lambda i: (i, 0)),
            scratch_shapes=[pltpu.VMEM((P1 * P1, C1), jnp.float32)],
        ),
        compiler_params=pltpu.CompilerParams(
            dimension_semantics=("parallel",)),
    )(x, w1, b1, w2, b2, f1w, f1b, f2w, f2b)
    return out[:n]


# ------------------------- pure-JAX reference (check) ------------------------

def bpmnet_reference(x_nchw, p):
    def conv(x, w, b):
        n, h, wdt, c = x.shape
        kh, kw, _, oc = w.shape
        oh, ow = h - kh + 1, wdt - kw + 1
        patches = jnp.stack([x[:, i:i + oh, j:j + ow, :]
                             for i in range(kh) for j in range(kw)], axis=3)
        y = patches.reshape(n * oh * ow, kh * kw * c) @ w.reshape(kh * kw * c, oc)
        return jnp.maximum(y + b, 0.0).reshape(n, oh, ow, oc)

    def pool(x):
        n, h, wdt, c = x.shape
        oh, ow = h // 2, wdt // 2
        x = x[:, :2 * oh, :2 * ow, :].reshape(n, oh, 2, ow, 2, c)
        return jnp.max(x, axis=(2, 4))

    x = jnp.transpose(x_nchw, (0, 2, 3, 1))
    x = pool(conv(x, p["w1"], p["b1"]))
    x = pool(conv(x, p["w2"], p["b2"]))
    x = x.reshape(x.shape[0], -1)
    h = jnp.maximum(x @ p["fc1_w"] + p["fc1_b"], 0.0)
    logits = h @ p["fc2_w"] + p["fc2_b"]
    return jax.nn.log_softmax(logits, axis=1)


# --------------------------------- params -----------------------------------

def init_params(key):
    ks = jax.random.split(key, 8)

    def u(k, shape, fan_in):
        bound = 1.0 / jnp.sqrt(fan_in)
        return jax.random.uniform(k, shape, jnp.float32, -bound, bound)

    return {
        "w1": u(ks[0], (K, K, IN_C, C1), K * K * IN_C),     # conv1 HWIO
        "b1": u(ks[1], (C1,), K * K * IN_C),
        "w2": u(ks[2], (K, K, C1, C2), K * K * C1),         # conv2 HWIO
        "b2": u(ks[3], (C2,), K * K * C1),
        "fc1_w": u(ks[4], (C2, FC1_OUT), C2),               # Linear (in, out)
        "fc1_b": u(ks[5], (FC1_OUT,), C2),
        "fc2_w": u(ks[6], (FC1_OUT, N_CLASSES), FC1_OUT),
        "fc2_b": u(ks[7], (N_CLASSES,), FC1_OUT),
    }


if __name__ == "__main__":
    key = jax.random.PRNGKey(0)
    kx, kp = jax.random.split(key)
    # Input spatial size 12 so that conv/pool/conv/pool yields 1x1x64, matching
    # the module's fc1.in_features == 64.
    x = jax.random.normal(kx, (2, IN_C, IN_H, IN_W), jnp.float32)
    params = init_params(kp)

    out = jax.block_until_ready(bpmnet_forward(x, params))
    ref = jax.block_until_ready(bpmnet_reference(x, params))

    assert out.shape == (2, N_CLASSES), out.shape
    assert jnp.allclose(out, ref, atol=1e-4, rtol=1e-4), (
        "mismatch vs reference, max abs err = "
        f"{jnp.max(jnp.abs(out - ref))}")
    # log-softmax rows should sum (in prob space) to 1
    assert jnp.allclose(jnp.sum(jnp.exp(out), axis=1), 1.0, atol=1e-4)

    print("KERNEL_OK")
</pallas_src>

<mosaic_0001>
module attributes {stable_mosaic.version = 11 : i64} {
  func.func @_bpmnet_kernel(%arg0: i32, %arg1: memref<8x144x3xf32, #tpu.memory_space<vmem>>, %arg2: memref<27x32xf32, #tpu.memory_space<vmem>>, %arg3: memref<1x32xf32, #tpu.memory_space<vmem>>, %arg4: memref<288x64xf32, #tpu.memory_space<vmem>>, %arg5: memref<1x64xf32, #tpu.memory_space<vmem>>, %arg6: memref<64x32xf32, #tpu.memory_space<vmem>>, %arg7: memref<1x32xf32, #tpu.memory_space<vmem>>, %arg8: memref<32x10xf32, #tpu.memory_space<vmem>>, %arg9: memref<1x10xf32, #tpu.memory_space<vmem>>, %arg10: memref<8x10xf32, #tpu.memory_space<vmem>>, %arg11: memref<25x32xf32, #tpu.memory_space<vmem>>) attributes {dimension_semantics = [#tpu.dimension_semantics<parallel>], iteration_bounds = array<i64: 1>, scalar_prefetch = 0 : i64, scratch_operands = 1 : i64, tpu.core_type = #tpu.core_type<tc>, window_params = [{transform_indices = @transform_0, window_bounds = array<i64: 8, 144, 3>}, {pipeline_mode = #tpu.pipeline_mode<synchronous>, transform_indices = @transform_1, window_bounds = array<i64: 27, 32>}, {pipeline_mode = #tpu.pipeline_mode<synchronous>, transform_indices = @transform_2, window_bounds = array<i64: 1, 32>}, {pipeline_mode = #tpu.pipeline_mode<synchronous>, transform_indices = @transform_3, window_bounds = array<i64: 288, 64>}, {pipeline_mode = #tpu.pipeline_mode<synchronous>, transform_indices = @transform_4, window_bounds = array<i64: 1, 64>}, {pipeline_mode = #tpu.pipeline_mode<synchronous>, transform_indices = @transform_5, window_bounds = array<i64: 64, 32>}, {pipeline_mode = #tpu.pipeline_mode<synchronous>, transform_indices = @transform_6, window_bounds = array<i64: 1, 32>}, {pipeline_mode = #tpu.pipeline_mode<synchronous>, transform_indices = @transform_7, window_bounds = array<i64: 32, 10>}, {pipeline_mode = #tpu.pipeline_mode<synchronous>, transform_indices = @transform_8, window_bounds = array<i64: 1, 10>}, {transform_indices = @transform_9, window_bounds = array<i64: 8, 10>}]} {
    %c0 = arith.constant 0 : index
    %c0_0 = arith.constant 0 : index
    %0 = vector.load %arg2[%c0, %c0_0] : memref<27x32xf32, #tpu.memory_space<vmem>>, vector<27x32xf32>
    %c0_1 = arith.constant 0 : index
    %c0_2 = arith.constant 0 : index
    %1 = vector.load %arg3[%c0_1, %c0_2] : memref<1x32xf32, #tpu.memory_space<vmem>>, vector<1x32xf32>
    %c0_3 = arith.constant 0 : index
    %c0_4 = arith.constant 0 : index
    %2 = vector.load %arg4[%c0_3, %c0_4] : memref<288x64xf32, #tpu.memory_space<vmem>>, vector<288x64xf32>
    %c0_5 = arith.constant 0 : index
    %c0_6 = arith.constant 0 : index
    %3 = vector.load %arg5[%c0_5, %c0_6] : memref<1x64xf32, #tpu.memory_space<vmem>>, vector<1x64xf32>
    %c0_7 = arith.constant 0 : index
    %c0_8 = arith.constant 0 : index
    %4 = vector.load %arg6[%c0_7, %c0_8] : memref<64x32xf32, #tpu.memory_space<vmem>>, vector<64x32xf32>
    %c0_9 = arith.constant 0 : index
    %c0_10 = arith.constant 0 : index
    %5 = vector.load %arg7[%c0_9, %c0_10] : memref<1x32xf32, #tpu.memory_space<vmem>>, vector<1x32xf32>
    %c0_11 = arith.constant 0 : index
    %c0_12 = arith.constant 0 : index
    %6 = vector.load %arg8[%c0_11, %c0_12] : memref<32x10xf32, #tpu.memory_space<vmem>>, vector<32x10xf32>
    %c0_13 = arith.constant 0 : index
    %c0_14 = arith.constant 0 : index
    %7 = vector.load %arg9[%c0_13, %c0_14] : memref<1x10xf32, #tpu.memory_space<vmem>>, vector<1x10xf32>
    %c0_i32 = arith.constant 0 : i32
    %c8_i32 = arith.constant 8 : i32
    %8 = arith.addi %c0_i32, %c8_i32 : i32
    %c1_i32 = arith.constant 1 : i32
    scf.for %arg12 = %c0_i32 to %8 step %c1_i32  : i32 {
      %9 = arith.index_cast %arg12 : i32 to index
      %c0_16 = arith.constant 0 : index
      %c0_17 = arith.constant 0 : index
      %10 = vector.load %arg1[%9, %c0_16, %c0_17] : memref<8x144x3xf32, #tpu.memory_space<vmem>>, vector<1x144x3xf32>
      %11 = vector.shape_cast %10 : vector<1x144x3xf32> to vector<144x3xf32>
      %12 = vector.extract_strided_slice %0 {offsets = [0, 0], sizes = [3, 32], strides = [1, 1]} : vector<27x32xf32> to vector<3x32xf32>
      %cst = arith.constant dense<0.000000e+00> : vector<144x32xf32>
      %13 = tpu.matmul %11, %12, %cst {dimension_numbers = #tpu.dot_dimension_numbers<[1], [0], [0], [1], [0, 0, 1, 1], [], []>} : vector<144x3xf32>, vector<3x32xf32>, vector<144x32xf32> -> vector<144x32xf32>
      %14 = vector.extract_strided_slice %0 {offsets = [3, 0], sizes = [3, 32], strides = [1, 1]} : vector<27x32xf32> to vector<3x32xf32>
      %cst_18 = arith.constant dense<0.000000e+00> : vector<144x32xf32>
      %15 = tpu.matmul %11, %14, %cst_18 {dimension_numbers = #tpu.dot_dimension_numbers<[1], [0], [0], [1], [0, 0, 1, 1], [], []>} : vector<144x3xf32>, vector<3x32xf32>, vector<144x32xf32> -> vector<144x32xf32>
      %16 = vector.extract_strided_slice %0 {offsets = [6, 0], sizes = [3, 32], strides = [1, 1]} : vector<27x32xf32> to vector<3x32xf32>
      %cst_19 = arith.constant dense<0.000000e+00> : vector<144x32xf32>
      %17 = tpu.matmul %11, %16, %cst_19 {dimension_numbers = #tpu.dot_dimension_numbers<[1], [0], [0], [1], [0, 0, 1, 1], [], []>} : vector<144x3xf32>, vector<3x32xf32>, vector<144x32xf32> -> vector<144x32xf32>
      %18 = vector.extract_strided_slice %0 {offsets = [9, 0], sizes = [3, 32], strides = [1, 1]} : vector<27x32xf32> to vector<3x32xf32>
      %cst_20 = arith.constant dense<0.000000e+00> : vector<144x32xf32>
      %19 = tpu.matmul %11, %18, %cst_20 {dimension_numbers = #tpu.dot_dimension_numbers<[1], [0], [0], [1], [0, 0, 1, 1], [], []>} : vector<144x3xf32>, vector<3x32xf32>, vector<144x32xf32> -> vector<144x32xf32>
      %20 = vector.extract_strided_slice %0 {offsets = [12, 0], sizes = [3, 32], strides = [1, 1]} : vector<27x32xf32> to vector<3x32xf32>
      %cst_21 = arith.constant dense<0.000000e+00> : vector<144x32xf32>
      %21 = tpu.matmul %11, %20, %cst_21 {dimension_numbers = #tpu.dot_dimension_numbers<[1], [0], [0], [1], [0, 0, 1, 1], [], []>} : vector<144x3xf32>, vector<3x32xf32>, vector<144x32xf32> -> vector<144x32xf32>
      %22 = vector.extract_strided_slice %0 {offsets = [15, 0], sizes = [3, 32], strides = [1, 1]} : vector<27x32xf32> to vector<3x32xf32>
      %cst_22 = arith.constant dense<0.000000e+00> : vector<144x32xf32>
      %23 = tpu.matmul %11, %22, %cst_22 {dimension_numbers = #tpu.dot_dimension_numbers<[1], [0], [0], [1], [0, 0, 1, 1], [], []>} : vector<144x3xf32>, vector<3x32xf32>, vector<144x32xf32> -> vector<144x32xf32>
      %24 = vector.extract_strided_slice %0 {offsets = [18, 0], sizes = [3, 32], strides = [1, 1]} : vector<27x32xf32> to vector<3x32xf32>
      %cst_23 = arith.constant dense<0.000000e+00> : vector<144x32xf32>
      %25 = tpu.matmul %11, %24, %cst_23 {dimension_numbers = #tpu.dot_dimension_numbers<[1], [0], [0], [1], [0, 0, 1, 1], [], []>} : vector<144x3xf32>, vector<3x32xf32>, vector<144x32xf32> -> vector<144x32xf32>
      %26 = vector.extract_strided_slice %0 {offsets = [21, 0], sizes = [3, 32], strides = [1, 1]} : vector<27x32xf32> to vector<3x32xf32>
      %cst_24 = arith.constant dense<0.000000e+00> : vector<144x32xf32>
      %27 = tpu.matmul %11, %26, %cst_24 {dimension_numbers = #tpu.dot_dimension_numbers<[1], [0], [0], [1], [0, 0, 1, 1], [], []>} : vector<144x3xf32>, vector<3x32xf32>, vector<144x32xf32> -> vector<144x32xf32>
      %28 = vector.extract_strided_slice %0 {offsets = [24, 0], sizes = [3, 32], strides = [1, 1]} : vector<27x32xf32> to vector<3x32xf32>
      %cst_25 = arith.constant dense<0.000000e+00> : vector<144x32xf32>
      %29 = tpu.matmul %11, %28, %cst_25 {dimension_numbers = #tpu.dot_dimension_numbers<[1], [0], [0], [1], [0, 0, 1, 1], [], []>} : vector<144x3xf32>, vector<3x32xf32>, vector<144x32xf32> -> vector<144x32xf32>
      %30 = vector.extract_strided_slice %13 {offsets = [0, 0], sizes = [10, 32], strides = [1, 1]} : vector<144x32xf32> to vector<10x32xf32>
      %31 = vector.extract_strided_slice %15 {offsets = [1, 0], sizes = [10, 32], strides = [1, 1]} : vector<144x32xf32> to vector<10x32xf32>
      %32 = arith.addf %30, %31 : vector<10x32xf32>
      %33 = vector.extract_strided_slice %17 {offsets = [2, 0], sizes = [10, 32], strides = [1, 1]} : vector<144x32xf32> to vector<10x32xf32>
      %34 = arith.addf %32, %33 : vector<10x32xf32>
      %35 = vector.extract_strided_slice %19 {offsets = [12, 0], sizes = [10, 32], strides = [1, 1]} : vector<144x32xf32> to vector<10x32xf32>
      %36 = arith.addf %34, %35 : vector<10x32xf32>
      %37 = vector.extract_strided_slice %21 {offsets = [13, 0], sizes = [10, 32], strides = [1, 1]} : vector<144x32xf32> to vector<10x32xf32>
      %38 = arith.addf %36, %37 : vector<10x32xf32>
      %39 = vector.extract_strided_slice %23 {offsets = [14, 0], sizes = [10, 32], strides = [1, 1]} : vector<144x32xf32> to vector<10x32xf32>
      %40 = arith.addf %38, %39 : vector<10x32xf32>
      %41 = vector.extract_strided_slice %25 {offsets = [24, 0], sizes = [10, 32], strides = [1, 1]} : vector<144x32xf32> to vector<10x32xf32>
      %42 = arith.addf %40, %41 : vector<10x32xf32>
      %43 = vector.extract_strided_slice %27 {offsets = [25, 0], sizes = [10, 32], strides = [1, 1]} : vector<144x32xf32> to vector<10x32xf32>
      %44 = arith.addf %42, %43 : vector<10x32xf32>
      %45 = vector.extract_strided_slice %29 {offsets = [26, 0], sizes = [10, 32], strides = [1, 1]} : vector<144x32xf32> to vector<10x32xf32>
      %46 = arith.addf %44, %45 : vector<10x32xf32>
      %47 = vector.broadcast %1 : vector<1x32xf32> to vector<10x32xf32>
      %48 = arith.addf %46, %47 : vector<10x32xf32>
      %cst_26 = arith.constant 0.000000e+00 : f32
      %49 = vector.broadcast %cst_26 : f32 to vector<10x32xf32>
      %50 = arith.maximumf %48, %49 : vector<10x32xf32>
      %51 = vector.extract_strided_slice %13 {offsets = [12, 0], sizes = [10, 32], strides = [1, 1]} : vector<144x32xf32> to vector<10x32xf32>
      %52 = vector.extract_strided_slice %15 {offsets = [13, 0], sizes = [10, 32], strides = [1, 1]} : vector<144x32xf32> to vector<10x32xf32>
      %53 = arith.addf %51, %52 : vector<10x32xf32>
      %54 = vector.extract_strided_slice %17 {offsets = [14, 0], sizes = [10, 32], strides = [1, 1]} : vector<144x32xf32> to vector<10x32xf32>
      %55 = arith.addf %53, %54 : vector<10x32xf32>
      %56 = vector.extract_strided_slice %19 {offsets = [24, 0], sizes = [10, 32], strides = [1, 1]} : vector<144x32xf32> to vector<10x32xf32>
      %57 = arith.addf %55, %56 : vector<10x32xf32>
      %58 = vector.extract_strided_slice %21 {offsets = [25, 0], sizes = [10, 32], strides = [1, 1]} : vector<144x32xf32> to vector<10x32xf32>
      %59 = arith.addf %57, %58 : vector<10x32xf32>
      %60 = vector.extract_strided_slice %23 {offsets = [26, 0], sizes = [10, 32], strides = [1, 1]} : vector<144x32xf32> to vector<10x32xf32>
      %61 = arith.addf %59, %60 : vector<10x32xf32>
      %62 = vector.extract_strided_slice %25 {offsets = [36, 0], sizes = [10, 32], strides = [1, 1]} : vector<144x32xf32> to vector<10x32xf32>
      %63 = arith.addf %61, %62 : vector<10x32xf32>
      %64 = vector.extract_strided_slice %27 {offsets = [37, 0], sizes = [10, 32], strides = [1, 1]} : vector<144x32xf32> to vector<10x32xf32>
      %65 = arith.addf %63, %64 : vector<10x32xf32>
      %66 = vector.extract_strided_slice %29 {offsets = [38, 0], sizes = [10, 32], strides = [1, 1]} : vector<144x32xf32> to vector<10x32xf32>
      %67 = arith.addf %65, %66 : vector<10x32xf32>
      %68 = vector.broadcast %1 : vector<1x32xf32> to vector<10x32xf32>
      %69 = arith.addf %67, %68 : vector<10x32xf32>
      %cst_27 = arith.constant 0.000000e+00 : f32
      %70 = vector.broadcast %cst_27 : f32 to vector<10x32xf32>
      %71 = arith.maximumf %69, %70 : vector<10x32xf32>
      %72 = vector.extract_strided_slice %13 {offsets = [24, 0], sizes = [10, 32], strides = [1, 1]} : vector<144x32xf32> to vector<10x32xf32>
      %73 = vector.extract_strided_slice %15 {offsets = [25, 0], sizes = [10, 32], strides = [1, 1]} : vector<144x32xf32> to vector<10x32xf32>
      %74 = arith.addf %72, %73 : vector<10x32xf32>
      %75 = vector.extract_strided_slice %17 {offsets = [26, 0], sizes = [10, 32], strides = [1, 1]} : vector<144x32xf32> to vector<10x32xf32>
      %76 = arith.addf %74, %75 : vector<10x32xf32>
      %77 = vector.extract_strided_slice %19 {offsets = [36, 0], sizes = [10, 32], strides = [1, 1]} : vector<144x32xf32> to vector<10x32xf32>
      %78 = arith.addf %76, %77 : vector<10x32xf32>
      %79 = vector.extract_strided_slice %21 {offsets = [37, 0], sizes = [10, 32], strides = [1, 1]} : vector<144x32xf32> to vector<10x32xf32>
      %80 = arith.addf %78, %79 : vector<10x32xf32>
      %81 = vector.extract_strided_slice %23 {offsets = [38, 0], sizes = [10, 32], strides = [1, 1]} : vector<144x32xf32> to vector<10x32xf32>
      %82 = arith.addf %80, %81 : vector<10x32xf32>
      %83 = vector.extract_strided_slice %25 {offsets = [48, 0], sizes = [10, 32], strides = [1, 1]} : vector<144x32xf32> to vector<10x32xf32>
      %84 = arith.addf %82, %83 : vector<10x32xf32>
      %85 = vector.extract_strided_slice %27 {offsets = [49, 0], sizes = [10, 32], strides = [1, 1]} : vector<144x32xf32> to vector<10x32xf32>
      %86 = arith.addf %84, %85 : vector<10x32xf32>
      %87 = vector.extract_strided_slice %29 {offsets = [50, 0], sizes = [10, 32], strides = [1, 1]} : vector<144x32xf32> to vector<10x32xf32>
      %88 = arith.addf %86, %87 : vector<10x32xf32>
      %89 = vector.broadcast %1 : vector<1x32xf32> to vector<10x32xf32>
      %90 = arith.addf %88, %89 : vector<10x32xf32>
      %cst_28 = arith.constant 0.000000e+00 : f32
      %91 = vector.broadcast %cst_28 : f32 to vector<10x32xf32>
      %92 = arith.maximumf %90, %91 : vector<10x32xf32>
      %93 = vector.extract_strided_slice %13 {offsets = [36, 0], sizes = [10, 32], strides = [1, 1]} : vector<144x32xf32> to vector<10x32xf32>
      %94 = vector.extract_strided_slice %15 {offsets = [37, 0], sizes = [10, 32], strides = [1, 1]} : vector<144x32xf32> to vector<10x32xf32>
      %95 = arith.addf %93, %94 : vector<10x32xf32>
      %96 = vector.extract_strided_slice %17 {offsets = [38, 0], sizes = [10, 32], strides = [1, 1]} : vector<144x32xf32> to vector<10x32xf32>
      %97 = arith.addf %95, %96 : vector<10x32xf32>
      %98 = vector.extract_strided_slice %19 {offsets = [48, 0], sizes = [10, 32], strides = [1, 1]} : vector<144x32xf32> to vector<10x32xf32>
      %99 = arith.addf %97, %98 : vector<10x32xf32>
      %100 = vector.extract_strided_slice %21 {offsets = [49, 0], sizes = [10, 32], strides = [1, 1]} : vector<144x32xf32> to vector<10x32xf32>
      %101 = arith.addf %99, %100 : vector<10x32xf32>
      %102 = vector.extract_strided_slice %23 {offsets = [50, 0], sizes = [10, 32], strides = [1, 1]} : vector<144x32xf32> to vector<10x32xf32>
      %103 = arith.addf %101, %102 : vector<10x32xf32>
      %104 = vector.extract_strided_slice %25 {offsets = [60, 0], sizes = [10, 32], strides = [1, 1]} : vector<144x32xf32> to vector<10x32xf32>
      %105 = arith.addf %103, %104 : vector<10x32xf32>
      %106 = vector.extract_strided_slice %27 {offsets = [61, 0], sizes = [10, 32], strides = [1, 1]} : vector<144x32xf32> to vector<10x32xf32>
      %107 = arith.addf %105, %106 : vector<10x32xf32>
      %108 = vector.extract_strided_slice %29 {offsets = [62, 0], sizes = [10, 32], strides = [1, 1]} : vector<144x32xf32> to vector<10x32xf32>
      %109 = arith.addf %107, %108 : vector<10x32xf32>
      %110 = vector.broadcast %1 : vector<1x32xf32> to vector<10x32xf32>
      %111 = arith.addf %109, %110 : vector<10x32xf32>
      %cst_29 = arith.constant 0.000000e+00 : f32
      %112 = vector.broadcast %cst_29 : f32 to vector<10x32xf32>
      %113 = arith.maximumf %111, %112 : vector<10x32xf32>
      %114 = vector.extract_strided_slice %13 {offsets = [48, 0], sizes = [10, 32], strides = [1, 1]} : vector<144x32xf32> to vector<10x32xf32>
      %115 = vector.extract_strided_slice %15 {offsets = [49, 0], sizes = [10, 32], strides = [1, 1]} : vector<144x32xf32> to vector<10x32xf32>
      %116 = arith.addf %114, %115 : vector<10x32xf32>
      %117 = vector.extract_strided_slice %17 {offsets = [50, 0], sizes = [10, 32], strides = [1, 1]} : vector<144x32xf32> to vector<10x32xf32>
      %118 = arith.addf %116, %117 : vector<10x32xf32>
      %119 = vector.extract_strided_slice %19 {offsets = [60, 0], sizes = [10, 32], strides = [1, 1]} : vector<144x32xf32> to vector<10x32xf32>
      %120 = arith.addf %118, %119 : vector<10x32xf32>
      %121 = vector.extract_strided_slice %21 {offsets = [61, 0], sizes = [10, 32], strides = [1, 1]} : vector<144x32xf32> to vector<10x32xf32>
      %122 = arith.addf %120, %121 : vector<10x32xf32>
      %123 = vector.extract_strided_slice %23 {offsets = [62, 0], sizes = [10, 32], strides = [1, 1]} : vector<144x32xf32> to vector<10x32xf32>
      %124 = arith.addf %122, %123 : vector<10x32xf32>
      %125 = vector.extract_strided_slice %25 {offsets = [72, 0], sizes = [10, 32], strides = [1, 1]} : vector<144x32xf32> to vector<10x32xf32>
      %126 = arith.addf %124, %125 : vector<10x32xf32>
      %127 = vector.extract_strided_slice %27 {offsets = [73, 0], sizes = [10, 32], strides = [1, 1]} : vector<144x32xf32> to vector<10x32xf32>
      %128 = arith.addf %126, %127 : vector<10x32xf32>
      %129 = vector.extract_strided_slice %29 {offsets = [74, 0], sizes = [10, 32], strides = [1, 1]} : vector<144x32xf32> to vector<10x32xf32>
      %130 = arith.addf %128, %129 : vector<10x32xf32>
      %131 = vector.broadcast %1 : vector<1x32xf32> to vector<10x32xf32>
      %132 = arith.addf %130, %131 : vector<10x32xf32>
      %cst_30 = arith.constant 0.000000e+00 : f32
      %133 = vector.broadcast %cst_30 : f32 to vector<10x32xf32>
      %134 = arith.maximumf %132, %133 : vector<10x32xf32>
      %135 = vector.extract_strided_slice %13 {offsets = [60, 0], sizes = [10, 32], strides = [1, 1]} : vector<144x32xf32> to vector<10x32xf32>
      %136 = vector.extract_strided_slice %15 {offsets = [61, 0], sizes = [10, 32], strides = [1, 1]} : vector<144x32xf32> to vector<10x32xf32>
      %137 = arith.addf %135, %136 : vector<10x32xf32>
      %138 = vector.extract_strided_slice %17 {offsets = [62, 0], sizes = [10, 32], strides = [1, 1]} : vector<144x32xf32> to vector<10x32xf32>
      %139 = arith.addf %137, %138 : vector<10x32xf32>
      %140 = vector.extract_strided_slice %19 {offsets = [72, 0], sizes = [10, 32], strides = [1, 1]} : vector<144x32xf32> to vector<10x32xf32>
      %141 = arith.addf %139, %140 : vector<10x32xf32>
      %142 = vector.extract_strided_slice %21 {offsets = [73, 0], sizes = [10, 32], strides = [1, 1]} : vector<144x32xf32> to vector<10x32xf32>
      %143 = arith.addf %141, %142 : vector<10x32xf32>
      %144 = vector.extract_strided_slice %23 {offsets = [74, 0], sizes = [10, 32], strides = [1, 1]} : vector<144x32xf32> to vector<10x32xf32>
      %145 = arith.addf %143, %144 : vector<10x32xf32>
      %146 = vector.extract_strided_slice %25 {offsets = [84, 0], sizes = [10, 32], strides = [1, 1]} : vector<144x32xf32> to vector<10x32xf32>
      %147 = arith.addf %145, %146 : vector<10x32xf32>
      %148 = vector.extract_strided_slice %27 {offsets = [85, 0], sizes = [10, 32], strides = [1, 1]} : vector<144x32xf32> to vector<10x32xf32>
      %149 = arith.addf %147, %148 : vector<10x32xf32>
      %150 = vector.extract_strided_slice %29 {offsets = [86, 0], sizes = [10, 32], strides = [1, 1]} : vector<144x32xf32> to vector<10x32xf32>
      %151 = arith.addf %149, %150 : vector<10x32xf32>
      %152 = vector.broadcast %1 : vector<1x32xf32> to vector<10x32xf32>
      %153 = arith.addf %151, %152 : vector<10x32xf32>
      %cst_31 = arith.constant 0.000000e+00 : f32
      %154 = vector.broadcast %cst_31 : f32 to vector<10x32xf32>
      %155 = arith.maximumf %153, %154 : vector<10x32xf32>
      %156 = vector.extract_strided_slice %13 {offsets = [72, 0], sizes = [10, 32], strides = [1, 1]} : vector<144x32xf32> to vector<10x32xf32>
      %157 = vector.extract_strided_slice %15 {offsets = [73, 0], sizes = [10, 32], strides = [1, 1]} : vector<144x32xf32> to vector<10x32xf32>
      %158 = arith.addf %156, %157 : vector<10x32xf32>
      %159 = vector.extract_strided_slice %17 {offsets = [74, 0], sizes = [10, 32], strides = [1, 1]} : vector<144x32xf32> to vector<10x32xf32>
      %160 = arith.addf %158, %159 : vector<10x32xf32>
      %161 = vector.extract_strided_slice %19 {offsets = [84, 0], sizes = [10, 32], strides = [1, 1]} : vector<144x32xf32> to vector<10x32xf32>
      %162 = arith.addf %160, %161 : vector<10x32xf32>
      %163 = vector.extract_strided_slice %21 {offsets = [85, 0], sizes = [10, 32], strides = [1, 1]} : vector<144x32xf32> to vector<10x32xf32>
      %164 = arith.addf %162, %163 : vector<10x32xf32>
      %165 = vector.extract_strided_slice %23 {offsets = [86, 0], sizes = [10, 32], strides = [1, 1]} : vector<144x32xf32> to vector<10x32xf32>
      %166 = arith.addf %164, %165 : vector<10x32xf32>
      %167 = vector.extract_strided_slice %25 {offsets = [96, 0], sizes = [10, 32], strides = [1, 1]} : vector<144x32xf32> to vector<10x32xf32>
      %168 = arith.addf %166, %167 : vector<10x32xf32>
      %169 = vector.extract_strided_slice %27 {offsets = [97, 0], sizes = [10, 32], strides = [1, 1]} : vector<144x32xf32> to vector<10x32xf32>
      %170 = arith.addf %168, %169 : vector<10x32xf32>
      %171 = vector.extract_strided_slice %29 {offsets = [98, 0], sizes = [10, 32], strides = [1, 1]} : vector<144x32xf32> to vector<10x32xf32>
      %172 = arith.addf %170, %171 : vector<10x32xf32>
      %173 = vector.broadcast %1 : vector<1x32xf32> to vector<10x32xf32>
      %174 = arith.addf %172, %173 : vector<10x32xf32>
      %cst_32 = arith.constant 0.000000e+00 : f32
      %175 = vector.broadcast %cst_32 : f32 to vector<10x32xf32>
      %176 = arith.maximumf %174, %175 : vector<10x32xf32>
      %177 = vector.extract_strided_slice %13 {offsets = [84, 0], sizes = [10, 32], strides = [1, 1]} : vector<144x32xf32> to vector<10x32xf32>
      %178 = vector.extract_strided_slice %15 {offsets = [85, 0], sizes = [10, 32], strides = [1, 1]} : vector<144x32xf32> to vector<10x32xf32>
      %179 = arith.addf %177, %178 : vector<10x32xf32>
      %180 = vector.extract_strided_slice %17 {offsets = [86, 0], sizes = [10, 32], strides = [1, 1]} : vector<144x32xf32> to vector<10x32xf32>
      %181 = arith.addf %179, %180 : vector<10x32xf32>
      %182 = vector.extract_strided_slice %19 {offsets = [96, 0], sizes = [10, 32], strides = [1, 1]} : vector<144x32xf32> to vector<10x32xf32>
      %183 = arith.addf %181, %182 : vector<10x32xf32>
      %184 = vector.extract_strided_slice %21 {offsets = [97, 0], sizes = [10, 32], strides = [1, 1]} : vector<144x32xf32> to vector<10x32xf32>
      %185 = arith.addf %183, %184 : vector<10x32xf32>
      %186 = vector.extract_strided_slice %23 {offsets = [98, 0], sizes = [10, 32], strides = [1, 1]} : vector<144x32xf32> to vector<10x32xf32>
      %187 = arith.addf %185, %186 : vector<10x32xf32>
      %188 = vector.extract_strided_slice %25 {offsets = [108, 0], sizes = [10, 32], strides = [1, 1]} : vector<144x32xf32> to vector<10x32xf32>
      %189 = arith.addf %187, %188 : vector<10x32xf32>
      %190 = vector.extract_strided_slice %27 {offsets = [109, 0], sizes = [10, 32], strides = [1, 1]} : vector<144x32xf32> to vector<10x32xf32>
      %191 = arith.addf %189, %190 : vector<10x32xf32>
      %192 = vector.extract_strided_slice %29 {offsets = [110, 0], sizes = [10, 32], strides = [1, 1]} : vector<144x32xf32> to vector<10x32xf32>
      %193 = arith.addf %191, %192 : vector<10x32xf32>
      %194 = vector.broadcast %1 : vector<1x32xf32> to vector<10x32xf32>
      %195 = arith.addf %193, %194 : vector<10x32xf32>
      %cst_33 = arith.constant 0.000000e+00 : f32
      %196 = vector.broadcast %cst_33 : f32 to vector<10x32xf32>
      %197 = arith.maximumf %195, %196 : vector<10x32xf32>
      %198 = vector.extract_strided_slice %13 {offsets = [96, 0], sizes = [10, 32], strides = [1, 1]} : vector<144x32xf32> to vector<10x32xf32>
      %199 = vector.extract_strided_slice %15 {offsets = [97, 0], sizes = [10, 32], strides = [1, 1]} : vector<144x32xf32> to vector<10x32xf32>
      %200 = arith.addf %198, %199 : vector<10x32xf32>
      %201 = vector.extract_strided_slice %17 {offsets = [98, 0], sizes = [10, 32], strides = [1, 1]} : vector<144x32xf32> to vector<10x32xf32>
      %202 = arith.addf %200, %201 : vector<10x32xf32>
      %203 = vector.extract_strided_slice %19 {offsets = [108, 0], sizes = [10, 32], strides = [1, 1]} : vector<144x32xf32> to vector<10x32xf32>
      %204 = arith.addf %202, %203 : vector<10x32xf32>
      %205 = vector.extract_strided_slice %21 {offsets = [109, 0], sizes = [10, 32], strides = [1, 1]} : vector<144x32xf32> to vector<10x32xf32>
      %206 = arith.addf %204, %205 : vector<10x32xf32>
      %207 = vector.extract_strided_slice %23 {offsets = [110, 0], sizes = [10, 32], strides = [1, 1]} : vector<144x32xf32> to vector<10x32xf32>
      %208 = arith.addf %206, %207 : vector<10x32xf32>
      %209 = vector.extract_strided_slice %25 {offsets = [120, 0], sizes = [10, 32], strides = [1, 1]} : vector<144x32xf32> to vector<10x32xf32>
      %210 = arith.addf %208, %209 : vector<10x32xf32>
      %211 = vector.extract_strided_slice %27 {offsets = [121, 0], sizes = [10, 32], strides = [1, 1]} : vector<144x32xf32> to vector<10x32xf32>
      %212 = arith.addf %210, %211 : vector<10x32xf32>
      %213 = vector.extract_strided_slice %29 {offsets = [122, 0], sizes = [10, 32], strides = [1, 1]} : vector<144x32xf32> to vector<10x32xf32>
      %214 = arith.addf %212, %213 : vector<10x32xf32>
      %215 = vector.broadcast %1 : vector<1x32xf32> to vector<10x32xf32>
      %216 = arith.addf %214, %215 : vector<10x32xf32>
      %cst_34 = arith.constant 0.000000e+00 : f32
      %217 = vector.broadcast %cst_34 : f32 to vector<10x32xf32>
      %218 = arith.maximumf %216, %217 : vector<10x32xf32>
      %219 = vector.extract_strided_slice %13 {offsets = [108, 0], sizes = [10, 32], strides = [1, 1]} : vector<144x32xf32> to vector<10x32xf32>
      %220 = vector.extract_strided_slice %15 {offsets = [109, 0], sizes = [10, 32], strides = [1, 1]} : vector<144x32xf32> to vector<10x32xf32>
      %221 = arith.addf %219, %220 : vector<10x32xf32>
      %222 = vector.extract_strided_slice %17 {offsets = [110, 0], sizes = [10, 32], strides = [1, 1]} : vector<144x32xf32> to vector<10x32xf32>
      %223 = arith.addf %221, %222 : vector<10x32xf32>
      %224 = vector.extract_strided_slice %19 {offsets = [120, 0], sizes = [10, 32], strides = [1, 1]} : vector<144x32xf32> to vector<10x32xf32>
      %225 = arith.addf %223, %224 : vector<10x32xf32>
      %226 = vector.extract_strided_slice %21 {offsets = [121, 0], sizes = [10, 32], strides = [1, 1]} : vector<144x32xf32> to vector<10x32xf32>
      %227 = arith.addf %225, %226 : vector<10x32xf32>
      %228 = vector.extract_strided_slice %23 {offsets = [122, 0], sizes = [10, 32], strides = [1, 1]} : vector<144x32xf32> to vector<10x32xf32>
      %229 = arith.addf %227, %228 : vector<10x32xf32>
      %230 = vector.extract_strided_slice %25 {offsets = [132, 0], sizes = [10, 32], strides = [1, 1]} : vector<144x32xf32> to vector<10x32xf32>
      %231 = arith.addf %229, %230 : vector<10x32xf32>
      %232 = vector.extract_strided_slice %27 {offsets = [133, 0], sizes = [10, 32], strides = [1, 1]} : vector<144x32xf32> to vector<10x32xf32>
      %233 = arith.addf %231, %232 : vector<10x32xf32>
      %234 = vector.extract_strided_slice %29 {offsets = [134, 0], sizes = [10, 32], strides = [1, 1]} : vector<144x32xf32> to vector<10x32xf32>
      %235 = arith.addf %233, %234 : vector<10x32xf32>
      %236 = vector.broadcast %1 : vector<1x32xf32> to vector<10x32xf32>
      %237 = arith.addf %235, %236 : vector<10x32xf32>
      %cst_35 = arith.constant 0.000000e+00 : f32
      %238 = vector.broadcast %cst_35 : f32 to vector<10x32xf32>
      %239 = arith.maximumf %237, %238 : vector<10x32xf32>
      %240 = arith.maximumf %50, %71 : vector<10x32xf32>
      %241 = vector.extract_strided_slice %240 {offsets = [0, 0], sizes = [1, 32], strides = [1, 1]} : vector<10x32xf32> to vector<1x32xf32>
      %242 = vector.extract_strided_slice %240 {offsets = [1, 0], sizes = [1, 32], strides = [1, 1]} : vector<10x32xf32> to vector<1x32xf32>
      %243 = arith.maximumf %241, %242 : vector<1x32xf32>
      %c0_36 = arith.constant 0 : index
      %c0_37 = arith.constant 0 : index
      %244 = vector.load %arg11[%c0_36, %c0_37] : memref<25x32xf32, #tpu.memory_space<vmem>>, vector<1x32xf32>
      tpu.vector_store %arg11[%c0_36, %c0_37], %243 {strides = array<i32>} : memref<25x32xf32, #tpu.memory_space<vmem>>, vector<1x32xf32>,
      %245 = vector.extract_strided_slice %240 {offsets = [2, 0], sizes = [1, 32], strides = [1, 1]} : vector<10x32xf32> to vector<1x32xf32>
      %246 = vector.extract_strided_slice %240 {offsets = [3, 0], sizes = [1, 32], strides = [1, 1]} : vector<10x32xf32> to vector<1x32xf32>
      %247 = arith.maximumf %245, %246 : vector<1x32xf32>
      %c1 = arith.constant 1 : index
      %c0_38 = arith.constant 0 : index
      %248 = vector.load %arg11[%c1, %c0_38] : memref<25x32xf32, #tpu.memory_space<vmem>>, vector<1x32xf32>
      tpu.vector_store %arg11[%c1, %c0_38], %247 {strides = array<i32>} : memref<25x32xf32, #tpu.memory_space<vmem>>, vector<1x32xf32>,
      %249 = vector.extract_strided_slice %240 {offsets = [4, 0], sizes = [1, 32], strides = [1, 1]} : vector<10x32xf32> to vector<1x32xf32>
      %250 = vector.extract_strided_slice %240 {offsets = [5, 0], sizes = [1, 32], strides = [1, 1]} : vector<10x32xf32> to vector<1x32xf32>
      %251 = arith.maximumf %249, %250 : vector<1x32xf32>
      %c2 = arith.constant 2 : index
      %c0_39 = arith.constant 0 : index
      %252 = vector.load %arg11[%c2, %c0_39] : memref<25x32xf32, #tpu.memory_space<vmem>>, vector<1x32xf32>
      tpu.vector_store %arg11[%c2, %c0_39], %251 {strides = array<i32>} : memref<25x32xf32, #tpu.memory_space<vmem>>, vector<1x32xf32>,
      %253 = vector.extract_strided_slice %240 {offsets = [6, 0], sizes = [1, 32], strides = [1, 1]} : vector<10x32xf32> to vector<1x32xf32>
      %254 = vector.extract_strided_slice %240 {offsets = [7, 0], sizes = [1, 32], strides = [1, 1]} : vector<10x32xf32> to vector<1x32xf32>
      %255 = arith.maximumf %253, %254 : vector<1x32xf32>
      %c3 = arith.constant 3 : index
      %c0_40 = arith.constant 0 : index
      %256 = vector.load %arg11[%c3, %c0_40] : memref<25x32xf32, #tpu.memory_space<vmem>>, vector<1x32xf32>
      tpu.vector_store %arg11[%c3, %c0_40], %255 {strides = array<i32>} : memref<25x32xf32, #tpu.memory_space<vmem>>, vector<1x32xf32>,
      %257 = vector.extract_strided_slice %240 {offsets = [8, 0], sizes = [1, 32], strides = [1, 1]} : vector<10x32xf32> to vector<1x32xf32>
      %258 = vector.extract_strided_slice %240 {offsets = [9, 0], sizes = [1, 32], strides = [1, 1]} : vector<10x32xf32> to vector<1x32xf32>
      %259 = arith.maximumf %257, %258 : vector<1x32xf32>
      %c4 = arith.constant 4 : index
      %c0_41 = arith.constant 0 : index
      %260 = vector.load %arg11[%c4, %c0_41] : memref<25x32xf32, #tpu.memory_space<vmem>>, vector<1x32xf32>
      tpu.vector_store %arg11[%c4, %c0_41], %259 {strides = array<i32>} : memref<25x32xf32, #tpu.memory_space<vmem>>, vector<1x32xf32>,
      %261 = arith.maximumf %92, %113 : vector<10x32xf32>
      %262 = vector.extract_strided_slice %261 {offsets = [0, 0], sizes = [1, 32], strides = [1, 1]} : vector<10x32xf32> to vector<1x32xf32>
      %263 = vector.extract_strided_slice %261 {offsets = [1, 0], sizes = [1, 32], strides = [1, 1]} : vector<10x32xf32> to vector<1x32xf32>
      %264 = arith.maximumf %262, %263 : vector<1x32xf32>
      %c5 = arith.constant 5 : index
      %c0_42 = arith.constant 0 : index
      %265 = vector.load %arg11[%c5, %c0_42] : memref<25x32xf32, #tpu.memory_space<vmem>>, vector<1x32xf32>
      tpu.vector_store %arg11[%c5, %c0_42], %264 {strides = array<i32>} : memref<25x32xf32, #tpu.memory_space<vmem>>, vector<1x32xf32>,
      %266 = vector.extract_strided_slice %261 {offsets = [2, 0], sizes = [1, 32], strides = [1, 1]} : vector<10x32xf32> to vector<1x32xf32>
      %267 = vector.extract_strided_slice %261 {offsets = [3, 0], sizes = [1, 32], strides = [1, 1]} : vector<10x32xf32> to vector<1x32xf32>
      %268 = arith.maximumf %266, %267 : vector<1x32xf32>
      %c6 = arith.constant 6 : index
      %c0_43 = arith.constant 0 : index
      %269 = vector.load %arg11[%c6, %c0_43] : memref<25x32xf32, #tpu.memory_space<vmem>>, vector<1x32xf32>
      tpu.vector_store %arg11[%c6, %c0_43], %268 {strides = array<i32>} : memref<25x32xf32, #tpu.memory_space<vmem>>, vector<1x32xf32>,
      %270 = vector.extract_strided_slice %261 {offsets = [4, 0], sizes = [1, 32], strides = [1, 1]} : vector<10x32xf32> to vector<1x32xf32>
      %271 = vector.extract_strided_slice %261 {offsets = [5, 0], sizes = [1, 32], strides = [1, 1]} : vector<10x32xf32> to vector<1x32xf32>
      %272 = arith.maximumf %270, %271 : vector<1x32xf32>
      %c7 = arith.constant 7 : index
      %c0_44 = arith.constant 0 : index
      %273 = vector.load %arg11[%c7, %c0_44] : memref<25x32xf32, #tpu.memory_space<vmem>>, vector<1x32xf32>
      tpu.vector_store %arg11[%c7, %c0_44], %272 {strides = array<i32>} : memref<25x32xf32, #tpu.memory_space<vmem>>, vector<1x32xf32>,
      %274 = vector.extract_strided_slice %261 {offsets = [6, 0], sizes = [1, 32], strides = [1, 1]} : vector<10x32xf32> to vector<1x32xf32>
      %275 = vector.extract_strided_slice %261 {offsets = [7, 0], sizes = [1, 32], strides = [1, 1]} : vector<10x32xf32> to vector<1x32xf32>
      %276 = arith.maximumf %274, %275 : vector<1x32xf32>
      %c8 = arith.constant 8 : index
      %c0_45 = arith.constant 0 : index
      %277 = vector.load %arg11[%c8, %c0_45] : memref<25x32xf32, #tpu.memory_space<vmem>>, vector<1x32xf32>
      tpu.vector_store %arg11[%c8, %c0_45], %276 {strides = array<i32>} : memref<25x32xf32, #tpu.memory_space<vmem>>, vector<1x32xf32>,
      %278 = vector.extract_strided_slice %261 {offsets = [8, 0], sizes = [1, 32], strides = [1, 1]} : vector<10x32xf32> to vector<1x32xf32>
      %279 = vector.extract_strided_slice %261 {offsets = [9, 0], sizes = [1, 32], strides = [1, 1]} : vector<10x32xf32> to vector<1x32xf32>
      %280 = arith.maximumf %278, %279 : vector<1x32xf32>
      %c9 = arith.constant 9 : index
      %c0_46 = arith.constant 0 : index
      %281 = vector.load %arg11[%c9, %c0_46] : memref<25x32xf32, #tpu.memory_space<vmem>>, vector<1x32xf32>
      tpu.vector_store %arg11[%c9, %c0_46], %280 {strides = array<i32>} : memref<25x32xf32, #tpu.memory_space<vmem>>, vector<1x32xf32>,
      %282 = arith.maximumf %134, %155 : vector<10x32xf32>
      %283 = vector.extract_strided_slice %282 {offsets = [0, 0], sizes = [1, 32], strides = [1, 1]} : vector<10x32xf32> to vector<1x32xf32>
      %284 = vector.extract_strided_slice %282 {offsets = [1, 0], sizes = [1, 32], strides = [1, 1]} : vector<10x32xf32> to vector<1x32xf32>
      %285 = arith.maximumf %283, %284 : vector<1x32xf32>
      %c10 = arith.constant 10 : index
      %c0_47 = arith.constant 0 : index
      %286 = vector.load %arg11[%c10, %c0_47] : memref<25x32xf32, #tpu.memory_space<vmem>>, vector<1x32xf32>
      tpu.vector_store %arg11[%c10, %c0_47], %285 {strides = array<i32>} : memref<25x32xf32, #tpu.memory_space<vmem>>, vector<1x32xf32>,
      %287 = vector.extract_strided_slice %282 {offsets = [2, 0], sizes = [1, 32], strides = [1, 1]} : vector<10x32xf32> to vector<1x32xf32>
      %288 = vector.extract_strided_slice %282 {offsets = [3, 0], sizes = [1, 32], strides = [1, 1]} : vector<10x32xf32> to vector<1x32xf32>
      %289 = arith.maximumf %287, %288 : vector<1x32xf32>
      %c11 = arith.constant 11 : index
      %c0_48 = arith.constant 0 : index
      %290 = vector.load %arg11[%c11, %c0_48] : memref<25x32xf32, #tpu.memory_space<vmem>>, vector<1x32xf32>
      tpu.vector_store %arg11[%c11, %c0_48], %289 {strides = array<i32>} : memref<25x32xf32, #tpu.memory_space<vmem>>, vector<1x32xf32>,
      %291 = vector.extract_strided_slice %282 {offsets = [4, 0], sizes = [1, 32], strides = [1, 1]} : vector<10x32xf32> to vector<1x32xf32>
      %292 = vector.extract_strided_slice %282 {offsets = [5, 0], sizes = [1, 32], strides = [1, 1]} : vector<10x32xf32> to vector<1x32xf32>
      %293 = arith.maximumf %291, %292 : vector<1x32xf32>
      %c12 = arith.constant 12 : index
      %c0_49 = arith.constant 0 : index
      %294 = vector.load %arg11[%c12, %c0_49] : memref<25x32xf32, #tpu.memory_space<vmem>>, vector<1x32xf32>
      tpu.vector_store %arg11[%c12, %c0_49], %293 {strides = array<i32>} : memref<25x32xf32, #tpu.memory_space<vmem>>, vector<1x32xf32>,
      %295 = vector.extract_strided_slice %282 {offsets = [6, 0], sizes = [1, 32], strides = [1, 1]} : vector<10x32xf32> to vector<1x32xf32>
      %296 = vector.extract_strided_slice %282 {offsets = [7, 0], sizes = [1, 32], strides = [1, 1]} : vector<10x32xf32> to vector<1x32xf32>
      %297 = arith.maximumf %295, %296 : vector<1x32xf32>
      %c13 = arith.constant 13 : index
      %c0_50 = arith.constant 0 : index
      %298 = vector.load %arg11[%c13, %c0_50] : memref<25x32xf32, #tpu.memory_space<vmem>>, vector<1x32xf32>
      tpu.vector_store %arg11[%c13, %c0_50], %297 {strides = array<i32>} : memref<25x32xf32, #tpu.memory_space<vmem>>, vector<1x32xf32>,
      %299 = vector.extract_strided_slice %282 {offsets = [8, 0], sizes = [1, 32], strides = [1, 1]} : vector<10x32xf32> to vector<1x32xf32>
      %300 = vector.extract_strided_slice %282 {offsets = [9, 0], sizes = [1, 32], strides = [1, 1]} : vector<10x32xf32> to vector<1x32xf32>
      %301 = arith.maximumf %299, %300 : vector<1x32xf32>
      %c14 = arith.constant 14 : index
      %c0_51 = arith.constant 0 : index
      %302 = vector.load %arg11[%c14, %c0_51] : memref<25x32xf32, #tpu.memory_space<vmem>>, vector<1x32xf32>
      tpu.vector_store %arg11[%c14, %c0_51], %301 {strides = array<i32>} : memref<25x32xf32, #tpu.memory_space<vmem>>, vector<1x32xf32>,
      %303 = arith.maximumf %176, %197 : vector<10x32xf32>
      %304 = vector.extract_strided_slice %303 {offsets = [0, 0], sizes = [1, 32], strides = [1, 1]} : vector<10x32xf32> to vector<1x32xf32>
      %305 = vector.extract_strided_slice %303 {offsets = [1, 0], sizes = [1, 32], strides = [1, 1]} : vector<10x32xf32> to vector<1x32xf32>
      %306 = arith.maximumf %304, %305 : vector<1x32xf32>
      %c15 = arith.constant 15 : index
      %c0_52 = arith.constant 0 : index
      %307 = vector.load %arg11[%c15, %c0_52] : memref<25x32xf32, #tpu.memory_space<vmem>>, vector<1x32xf32>
      tpu.vector_store %arg11[%c15, %c0_52], %306 {strides = array<i32>} : memref<25x32xf32, #tpu.memory_space<vmem>>, vector<1x32xf32>,
      %308 = vector.extract_strided_slice %303 {offsets = [2, 0], sizes = [1, 32], strides = [1, 1]} : vector<10x32xf32> to vector<1x32xf32>
      %309 = vector.extract_strided_slice %303 {offsets = [3, 0], sizes = [1, 32], strides = [1, 1]} : vector<10x32xf32> to vector<1x32xf32>
      %310 = arith.maximumf %308, %309 : vector<1x32xf32>
      %c16 = arith.constant 16 : index
      %c0_53 = arith.constant 0 : index
      %311 = vector.load %arg11[%c16, %c0_53] : memref<25x32xf32, #tpu.memory_space<vmem>>, vector<1x32xf32>
      tpu.vector_store %arg11[%c16, %c0_53], %310 {strides = array<i32>} : memref<25x32xf32, #tpu.memory_space<vmem>>, vector<1x32xf32>,
      %312 = vector.extract_strided_slice %303 {offsets = [4, 0], sizes = [1, 32], strides = [1, 1]} : vector<10x32xf32> to vector<1x32xf32>
      %313 = vector.extract_strided_slice %303 {offsets = [5, 0], sizes = [1, 32], strides = [1, 1]} : vector<10x32xf32> to vector<1x32xf32>
      %314 = arith.maximumf %312, %313 : vector<1x32xf32>
      %c17 = arith.constant 17 : index
      %c0_54 = arith.constant 0 : index
      %315 = vector.load %arg11[%c17, %c0_54] : memref<25x32xf32, #tpu.memory_space<vmem>>, vector<1x32xf32>
      tpu.vector_store %arg11[%c17, %c0_54], %314 {strides = array<i32>} : memref<25x32xf32, #tpu.memory_space<vmem>>, vector<1x32xf32>,
      %316 = vector.extract_strided_slice %303 {offsets = [6, 0], sizes = [1, 32], strides = [1, 1]} : vector<10x32xf32> to vector<1x32xf32>
      %317 = vector.extract_strided_slice %303 {offsets = [7, 0], sizes = [1, 32], strides = [1, 1]} : vector<10x32xf32> to vector<1x32xf32>
      %318 = arith.maximumf %316, %317 : vector<1x32xf32>
      %c18 = arith.constant 18 : index
      %c0_55 = arith.constant 0 : index
      %319 = vector.load %arg11[%c18, %c0_55] : memref<25x32xf32, #tpu.memory_space<vmem>>, vector<1x32xf32>
      tpu.vector_store %arg11[%c18, %c0_55], %318 {strides = array<i32>} : memref<25x32xf32, #tpu.memory_space<vmem>>, vector<1x32xf32>,
      %320 = vector.extract_strided_slice %303 {offsets = [8, 0], sizes = [1, 32], strides = [1, 1]} : vector<10x32xf32> to vector<1x32xf32>
      %321 = vector.extract_strided_slice %303 {offsets = [9, 0], sizes = [1, 32], strides = [1, 1]} : vector<10x32xf32> to vector<1x32xf32>
      %322 = arith.maximumf %320, %321 : vector<1x32xf32>
      %c19 = arith.constant 19 : index
      %c0_56 = arith.constant 0 : index
      %323 = vector.load %arg11[%c19, %c0_56] : memref<25x32xf32, #tpu.memory_space<vmem>>, vector<1x32xf32>
      tpu.vector_store %arg11[%c19, %c0_56], %322 {strides = array<i32>} : memref<25x32xf32, #tpu.memory_space<vmem>>, vector<1x32xf32>,
      %324 = arith.maximumf %218, %239 : vector<10x32xf32>
      %325 = vector.extract_strided_slice %324 {offsets = [0, 0], sizes = [1, 32], strides = [1, 1]} : vector<10x32xf32> to vector<1x32xf32>
      %326 = vector.extract_strided_slice %324 {offsets = [1, 0], sizes = [1, 32], strides = [1, 1]} : vector<10x32xf32> to vector<1x32xf32>
      %327 = arith.maximumf %325, %326 : vector<1x32xf32>
      %c20 = arith.constant 20 : index
      %c0_57 = arith.constant 0 : index
      %328 = vector.load %arg11[%c20, %c0_57] : memref<25x32xf32, #tpu.memory_space<vmem>>, vector<1x32xf32>
      tpu.vector_store %arg11[%c20, %c0_57], %327 {strides = array<i32>} : memref<25x32xf32, #tpu.memory_space<vmem>>, vector<1x32xf32>,
      %329 = vector.extract_strided_slice %324 {offsets = [2, 0], sizes = [1, 32], strides = [1, 1]} : vector<10x32xf32> to vector<1x32xf32>
      %330 = vector.extract_strided_slice %324 {offsets = [3, 0], sizes = [1, 32], strides = [1, 1]} : vector<10x32xf32> to vector<1x32xf32>
      %331 = arith.maximumf %329, %330 : vector<1x32xf32>
      %c21 = arith.constant 21 : index
      %c0_58 = arith.constant 0 : index
      %332 = vector.load %arg11[%c21, %c0_58] : memref<25x32xf32, #tpu.memory_space<vmem>>, vector<1x32xf32>
      tpu.vector_store %arg11[%c21, %c0_58], %331 {strides = array<i32>} : memref<25x32xf32, #tpu.memory_space<vmem>>, vector<1x32xf32>,
      %333 = vector.extract_strided_slice %324 {offsets = [4, 0], sizes = [1, 32], strides = [1, 1]} : vector<10x32xf32> to vector<1x32xf32>
      %334 = vector.extract_strided_slice %324 {offsets = [5, 0], sizes = [1, 32], strides = [1, 1]} : vector<10x32xf32> to vector<1x32xf32>
      %335 = arith.maximumf %333, %334 : vector<1x32xf32>
      %c22 = arith.constant 22 : index
      %c0_59 = arith.constant 0 : index
      %336 = vector.load %arg11[%c22, %c0_59] : memref<25x32xf32, #tpu.memory_space<vmem>>, vector<1x32xf32>
      tpu.vector_store %arg11[%c22, %c0_59], %335 {strides = array<i32>} : memref<25x32xf32, #tpu.memory_space<vmem>>, vector<1x32xf32>,
      %337 = vector.extract_strided_slice %324 {offsets = [6, 0], sizes = [1, 32], strides = [1, 1]} : vector<10x32xf32> to vector<1x32xf32>
      %338 = vector.extract_strided_slice %324 {offsets = [7, 0], sizes = [1, 32], strides = [1, 1]} : vector<10x32xf32> to vector<1x32xf32>
      %339 = arith.maximumf %337, %338 : vector<1x32xf32>
      %c23 = arith.constant 23 : index
      %c0_60 = arith.constant 0 : index
      %340 = vector.load %arg11[%c23, %c0_60] : memref<25x32xf32, #tpu.memory_space<vmem>>, vector<1x32xf32>
      tpu.vector_store %arg11[%c23, %c0_60], %339 {strides = array<i32>} : memref<25x32xf32, #tpu.memory_space<vmem>>, vector<1x32xf32>,
      %341 = vector.extract_strided_slice %324 {offsets = [8, 0], sizes = [1, 32], strides = [1, 1]} : vector<10x32xf32> to vector<1x32xf32>
      %342 = vector.extract_strided_slice %324 {offsets = [9, 0], sizes = [1, 32], strides = [1, 1]} : vector<10x32xf32> to vector<1x32xf32>
      %343 = arith.maximumf %341, %342 : vector<1x32xf32>
      %c24 = arith.constant 24 : index
      %c0_61 = arith.constant 0 : index
      %344 = vector.load %arg11[%c24, %c0_61] : memref<25x32xf32, #tpu.memory_space<vmem>>, vector<1x32xf32>
      tpu.vector_store %arg11[%c24, %c0_61], %343 {strides = array<i32>} : memref<25x32xf32, #tpu.memory_space<vmem>>, vector<1x32xf32>,
      %c0_62 = arith.constant 0 : index
      %c0_63 = arith.constant 0 : index
      %345 = vector.load %arg11[%c0_62, %c0_63] : memref<25x32xf32, #tpu.memory_space<vmem>>, vector<25x32xf32>
      %346 = vector.extract_strided_slice %2 {offsets = [0, 0], sizes = [32, 64], strides = [1, 1]} : vector<288x64xf32> to vector<32x64xf32>
      %cst_64 = arith.constant dense<0.000000e+00> : vector<25x64xf32>
      %347 = tpu.matmul %345, %346, %cst_64 {dimension_numbers = #tpu.dot_dimension_numbers<[1], [0], [0], [1], [0, 0, 1, 1], [], []>} : vector<25x32xf32>, vector<32x64xf32>, vector<25x64xf32> -> vector<25x64xf32>
      %348 = vector.extract_strided_slice %2 {offsets = [32, 0], sizes = [32, 64], strides = [1, 1]} : vector<288x64xf32> to vector<32x64xf32>
      %cst_65 = arith.constant dense<0.000000e+00> : vector<25x64xf32>
      %349 = tpu.matmul %345, %348, %cst_65 {dimension_numbers = #tpu.dot_dimension_numbers<[1], [0], [0], [1], [0, 0, 1, 1], [], []>} : vector<25x32xf32>, vector<32x64xf32>, vector<25x64xf32> -> vector<25x64xf32>
      %350 = vector.extract_strided_slice %2 {offsets = [64, 0], sizes = [32, 64], strides = [1, 1]} : vector<288x64xf32> to vector<32x64xf32>
      %cst_66 = arith.constant dense<0.000000e+00> : vector<25x64xf32>
      %351 = tpu.matmul %345, %350, %cst_66 {dimension_numbers = #tpu.dot_dimension_numbers<[1], [0], [0], [1], [0, 0, 1, 1], [], []>} : vector<25x32xf32>, vector<32x64xf32>, vector<25x64xf32> -> vector<25x64xf32>
      %352 = vector.extract_strided_slice %2 {offsets = [96, 0], sizes = [32, 64], strides = [1, 1]} : vector<288x64xf32> to vector<32x64xf32>
      %cst_67 = arith.constant dense<0.000000e+00> : vector<25x64xf32>
      %353 = tpu.matmul %345, %352, %cst_67 {dimension_numbers = #tpu.dot_dimension_numbers<[1], [0], [0], [1], [0, 0, 1, 1], [], []>} : vector<25x32xf32>, vector<32x64xf32>, vector<25x64xf32> -> vector<25x64xf32>
      %354 = vector.extract_strided_slice %2 {offsets = [128, 0], sizes = [32, 64], strides = [1, 1]} : vector<288x64xf32> to vector<32x64xf32>
      %cst_68 = arith.constant dense<0.000000e+00> : vector<25x64xf32>
      %355 = tpu.matmul %345, %354, %cst_68 {dimension_numbers = #tpu.dot_dimension_numbers<[1], [0], [0], [1], [0, 0, 1, 1], [], []>} : vector<25x32xf32>, vector<32x64xf32>, vector<25x64xf32> -> vector<25x64xf32>
      %356 = vector.extract_strided_slice %2 {offsets = [160, 0], sizes = [32, 64], strides = [1, 1]} : vector<288x64xf32> to vector<32x64xf32>
      %cst_69 = arith.constant dense<0.000000e+00> : vector<25x64xf32>
      %357 = tpu.matmul %345, %356, %cst_69 {dimension_numbers = #tpu.dot_dimension_numbers<[1], [0], [0], [1], [0, 0, 1, 1], [], []>} : vector<25x32xf32>, vector<32x64xf32>, vector<25x64xf32> -> vector<25x64xf32>
      %358 = vector.extract_strided_slice %2 {offsets = [192, 0], sizes = [32, 64], strides = [1, 1]} : vector<288x64xf32> to vector<32x64xf32>
      %cst_70 = arith.constant dense<0.000000e+00> : vector<25x64xf32>
      %359 = tpu.matmul %345, %358, %cst_70 {dimension_numbers = #tpu.dot_dimension_numbers<[1], [0], [0], [1], [0, 0, 1, 1], [], []>} : vector<25x32xf32>, vector<32x64xf32>, vector<25x64xf32> -> vector<25x64xf32>
      %360 = vector.extract_strided_slice %2 {offsets = [224, 0], sizes = [32, 64], strides = [1, 1]} : vector<288x64xf32> to vector<32x64xf32>
      %cst_71 = arith.constant dense<0.000000e+00> : vector<25x64xf32>
      %361 = tpu.matmul %345, %360, %cst_71 {dimension_numbers = #tpu.dot_dimension_numbers<[1], [0], [0], [1], [0, 0, 1, 1], [], []>} : vector<25x32xf32>, vector<32x64xf32>, vector<25x64xf32> -> vector<25x64xf32>
      %362 = vector.extract_strided_slice %2 {offsets = [256, 0], sizes = [32, 64], strides = [1, 1]} : vector<288x64xf32> to vector<32x64xf32>
      %cst_72 = arith.constant dense<0.000000e+00> : vector<25x64xf32>
      %363 = tpu.matmul %345, %362, %cst_72 {dimension_numbers = #tpu.dot_dimension_numbers<[1], [0], [0], [1], [0, 0, 1, 1], [], []>} : vector<25x32xf32>, vector<32x64xf32>, vector<25x64xf32> -> vector<25x64xf32>
      %364 = vector.extract_strided_slice %347 {offsets = [0, 0], sizes = [3, 64], strides = [1, 1]} : vector<25x64xf32> to vector<3x64xf32>
      %365 = vector.extract_strided_slice %349 {offsets = [1, 0], sizes = [3, 64], strides = [1, 1]} : vector<25x64xf32> to vector<3x64xf32>
      %366 = arith.addf %364, %365 : vector<3x64xf32>
      %367 = vector.extract_strided_slice %351 {offsets = [2, 0], sizes = [3, 64], strides = [1, 1]} : vector<25x64xf32> to vector<3x64xf32>
      %368 = arith.addf %366, %367 : vector<3x64xf32>
      %369 = vector.extract_strided_slice %353 {offsets = [5, 0], sizes = [3, 64], strides = [1, 1]} : vector<25x64xf32> to vector<3x64xf32>
      %370 = arith.addf %368, %369 : vector<3x64xf32>
      %371 = vector.extract_strided_slice %355 {offsets = [6, 0], sizes = [3, 64], strides = [1, 1]} : vector<25x64xf32> to vector<3x64xf32>
      %372 = arith.addf %370, %371 : vector<3x64xf32>
      %373 = vector.extract_strided_slice %357 {offsets = [7, 0], sizes = [3, 64], strides = [1, 1]} : vector<25x64xf32> to vector<3x64xf32>
      %374 = arith.addf %372, %373 : vector<3x64xf32>
      %375 = vector.extract_strided_slice %359 {offsets = [10, 0], sizes = [3, 64], strides = [1, 1]} : vector<25x64xf32> to vector<3x64xf32>
      %376 = arith.addf %374, %375 : vector<3x64xf32>
      %377 = vector.extract_strided_slice %361 {offsets = [11, 0], sizes = [3, 64], strides = [1, 1]} : vector<25x64xf32> to vector<3x64xf32>
      %378 = arith.addf %376, %377 : vector<3x64xf32>
      %379 = vector.extract_strided_slice %363 {offsets = [12, 0], sizes = [3, 64], strides = [1, 1]} : vector<25x64xf32> to vector<3x64xf32>
      %380 = arith.addf %378, %379 : vector<3x64xf32>
      %381 = vector.broadcast %3 : vector<1x64xf32> to vector<3x64xf32>
      %382 = arith.addf %380, %381 : vector<3x64xf32>
      %cst_73 = arith.constant 0.000000e+00 : f32
      %383 = vector.broadcast %cst_73 : f32 to vector<3x64xf32>
      %384 = arith.maximumf %382, %383 : vector<3x64xf32>
      %385 = vector.extract_strided_slice %347 {offsets = [5, 0], sizes = [3, 64], strides = [1, 1]} : vector<25x64xf32> to vector<3x64xf32>
      %386 = vector.extract_strided_slice %349 {offsets = [6, 0], sizes = [3, 64], strides = [1, 1]} : vector<25x64xf32> to vector<3x64xf32>
      %387 = arith.addf %385, %386 : vector<3x64xf32>
      %388 = vector.extract_strided_slice %351 {offsets = [7, 0], sizes = [3, 64], strides = [1, 1]} : vector<25x64xf32> to vector<3x64xf32>
      %389 = arith.addf %387, %388 : vector<3x64xf32>
      %390 = vector.extract_strided_slice %353 {offsets = [10, 0], sizes = [3, 64], strides = [1, 1]} : vector<25x64xf32> to vector<3x64xf32>
      %391 = arith.addf %389, %390 : vector<3x64xf32>
      %392 = vector.extract_strided_slice %355 {offsets = [11, 0], sizes = [3, 64], strides = [1, 1]} : vector<25x64xf32> to vector<3x64xf32>
      %393 = arith.addf %391, %392 : vector<3x64xf32>
      %394 = vector.extract_strided_slice %357 {offsets = [12, 0], sizes = [3, 64], strides = [1, 1]} : vector<25x64xf32> to vector<3x64xf32>
      %395 = arith.addf %393, %394 : vector<3x64xf32>
      %396 = vector.extract_strided_slice %359 {offsets = [15, 0], sizes = [3, 64], strides = [1, 1]} : vector<25x64xf32> to vector<3x64xf32>
      %397 = arith.addf %395, %396 : vector<3x64xf32>
      %398 = vector.extract_strided_slice %361 {offsets = [16, 0], sizes = [3, 64], strides = [1, 1]} : vector<25x64xf32> to vector<3x64xf32>
      %399 = arith.addf %397, %398 : vector<3x64xf32>
      %400 = vector.extract_strided_slice %363 {offsets = [17, 0], sizes = [3, 64], strides = [1, 1]} : vector<25x64xf32> to vector<3x64xf32>
      %401 = arith.addf %399, %400 : vector<3x64xf32>
      %402 = vector.broadcast %3 : vector<1x64xf32> to vector<3x64xf32>
      %403 = arith.addf %401, %402 : vector<3x64xf32>
      %cst_74 = arith.constant 0.000000e+00 : f32
      %404 = vector.broadcast %cst_74 : f32 to vector<3x64xf32>
      %405 = arith.maximumf %403, %404 : vector<3x64xf32>
      %406 = vector.extract_strided_slice %384 {offsets = [0, 0], sizes = [2, 64], strides = [1, 1]} : vector<3x64xf32> to vector<2x64xf32>
      %407 = vector.extract_strided_slice %405 {offsets = [0, 0], sizes = [2, 64], strides = [1, 1]} : vector<3x64xf32> to vector<2x64xf32>
      %408 = arith.maximumf %406, %407 : vector<2x64xf32>
      %409 = vector.extract_strided_slice %408 {offsets = [0, 0], sizes = [1, 64], strides = [1, 1]} : vector<2x64xf32> to vector<1x64xf32>
      %410 = vector.extract_strided_slice %408 {offsets = [1, 0], sizes = [1, 64], strides = [1, 1]} : vector<2x64xf32> to vector<1x64xf32>
      %411 = arith.maximumf %409, %410 : vector<1x64xf32>
      %cst_75 = arith.constant dense<0.000000e+00> : vector<1x32xf32>
      %412 = tpu.matmul %411, %4, %cst_75 {dimension_numbers = #tpu.dot_dimension_numbers<[1], [0], [0], [1], [0, 0, 1, 1], [], []>} : vector<1x64xf32>, vector<64x32xf32>, vector<1x32xf32> -> vector<1x32xf32>
      %413 = arith.addf %412, %5 : vector<1x32xf32>
      %cst_76 = arith.constant 0.000000e+00 : f32
      %414 = vector.broadcast %cst_76 : f32 to vector<1x32xf32>
      %415 = arith.maximumf %413, %414 : vector<1x32xf32>
      %cst_77 = arith.constant dense<0.000000e+00> : vector<1x10xf32>
      %416 = tpu.matmul %415, %6, %cst_77 {dimension_numbers = #tpu.dot_dimension_numbers<[1], [0], [0], [1], [0, 0, 1, 1], [], []>} : vector<1x32xf32>, vector<32x10xf32>, vector<1x10xf32> -> vector<1x10xf32>
      %417 = arith.addf %416, %7 : vector<1x10xf32>
      %cst_78 = arith.constant dense<0xFF800000> : vector<1xf32>
      %418 = vector.multi_reduction <maximumf>, %417, %cst_78 [1] : vector<1x10xf32> to vector<1xf32>
      %419 = vector.shape_cast %418 : vector<1xf32> to vector<1x1xf32>
      %420 = vector.broadcast %419 : vector<1x1xf32> to vector<1x10xf32>
      %421 = arith.subf %417, %420 : vector<1x10xf32>
      %422 = math.exp %421 : vector<1x10xf32>
      %cst_79 = arith.constant dense<0.000000e+00> : vector<1xf32>
      %423 = vector.multi_reduction <add>, %422, %cst_79 [1] : vector<1x10xf32> to vector<1xf32>
      %424 = vector.shape_cast %423 : vector<1xf32> to vector<1x1xf32>
      %425 = math.log %424 : vector<1x1xf32>
      %426 = vector.broadcast %425 : vector<1x1xf32> to vector<1x10xf32>
      %427 = arith.subf %421, %426 : vector<1x10xf32>
      %428 = arith.index_cast %arg12 : i32 to index
      %c0_80 = arith.constant 0 : index
      %429 = vector.load %arg10[%428, %c0_80] : memref<8x10xf32, #tpu.memory_space<vmem>>, vector<1x10xf32>
      tpu.vector_store %arg10[%428, %c0_80], %427 {strides = array<i32>} : memref<8x10xf32, #tpu.memory_space<vmem>>, vector<1x10xf32>,
    }
    %c8_i32_15 = arith.constant 8 : i32
    return
  }
  func.func @transform_0(%arg0: i32) -> (i32, i32, i32) {
    %c0_i32 = arith.constant 0 : i32
    %c0_i32_0 = arith.constant 0 : i32
    %c0_i32_1 = arith.constant 0 : i32
    return %arg0, %c0_i32, %c0_i32_0 : i32, i32, i32
  }
  func.func @transform_1(%arg0: i32) -> (i32, i32) {
    %c0_i32 = arith.constant 0 : i32
    %c0_i32_0 = arith.constant 0 : i32
    %c0_i32_1 = arith.constant 0 : i32
    return %c0_i32, %c0_i32_0 : i32, i32
  }
  func.func @transform_2(%arg0: i32) -> (i32, i32) {
    %c0_i32 = arith.constant 0 : i32
    %c0_i32_0 = arith.constant 0 : i32
    %c0_i32_1 = arith.constant 0 : i32
    return %c0_i32, %c0_i32_0 : i32, i32
  }
  func.func @transform_3(%arg0: i32) -> (i32, i32) {
    %c0_i32 = arith.constant 0 : i32
    %c0_i32_0 = arith.constant 0 : i32
    %c0_i32_1 = arith.constant 0 : i32
    return %c0_i32, %c0_i32_0 : i32, i32
  }
  func.func @transform_4(%arg0: i32) -> (i32, i32) {
    %c0_i32 = arith.constant 0 : i32
    %c0_i32_0 = arith.constant 0 : i32
    %c0_i32_1 = arith.constant 0 : i32
    return %c0_i32, %c0_i32_0 : i32, i32
  }
  func.func @transform_5(%arg0: i32) -> (i32, i32) {
    %c0_i32 = arith.constant 0 : i32
    %c0_i32_0 = arith.constant 0 : i32
    %c0_i32_1 = arith.constant 0 : i32
    return %c0_i32, %c0_i32_0 : i32, i32
  }
  func.func @transform_6(%arg0: i32) -> (i32, i32) {
    %c0_i32 = arith.constant 0 : i32
    %c0_i32_0 = arith.constant 0 : i32
    %c0_i32_1 = arith.constant 0 : i32
    return %c0_i32, %c0_i32_0 : i32, i32
  }
  func.func @transform_7(%arg0: i32) -> (i32, i32) {
    %c0_i32 = arith.constant 0 : i32
    %c0_i32_0 = arith.constant 0 : i32
    %c0_i32_1 = arith.constant 0 : i32
    return %c0_i32, %c0_i32_0 : i32, i32
  }
  func.func @transform_8(%arg0: i32) -> (i32, i32) {
    %c0_i32 = arith.constant 0 : i32
    %c0_i32_0 = arith.constant 0 : i32
    %c0_i32_1 = arith.constant 0 : i32
    return %c0_i32, %c0_i32_0 : i32, i32
  }
  func.func @transform_9(%arg0: i32) -> (i32, i32) {
    %c0_i32 = arith.constant 0 : i32
    %c0_i32_0 = arith.constant 0 : i32
    return %arg0, %c0_i32 : i32, i32
  }
}

</mosaic_0001>

<bundles_post_ra>
// kernel: bpmnet_forward.1
= control target key start
LH: loop header
LB: loop body
LE: loop exit
PB: predicated region body
PF: predicated region fallthrough
CT: control target
= control target key end

     0   :  { %s3460_s0 = inlined_call_operand.vmem [shape: f32[8,144,3], index: 0, kind: input, shape index: {}]   ;;  %s3461_s1 = inlined_call_operand.vmem [shape: f32[27,32], index: 1, kind: input, shape index: {}]   ;;  %s3462_s2 = inlined_call_operand.vmem [shape: f32[1,32], index: 2, kind: input, shape index: {}]   ;;  %s3463_s3 = inlined_call_operand.vmem [shape: f32[288,64], index: 3, kind: input, shape index: {}]   ;;  %s3464_s9 = inlined_call_operand.vmem [shape: f32[8,10], index: 9, kind: output, shape index: {}]   ;;  %s3465_s4 = inlined_call_operand.vmem [shape: f32[1,64], index: 4, kind: input, shape index: {}]   ;;  %s3466_s5 = inlined_call_operand.vmem [shape: f32[64,32], index: 5, kind: input, shape index: {}]   ;;  %s3467_s6 = inlined_call_operand.vmem [shape: f32[1,32], index: 6, kind: input, shape index: {}]   ;;  %s3468_s7 = inlined_call_operand.vmem [shape: f32[32,10], index: 7, kind: input, shape index: {}]   ;;  %s3469_s8 = inlined_call_operand.vmem [shape: f32[1,10], index: 8, kind: input, shape index: {}]  }
   0x1   :  { %v2269_v0 = vld [vmem:[%s3461_s1] sm:$0xff]  ;;  %v2274_v1 = vld [vmem:[%s3461_s1 + $0x8] sm:$0xff]  ;;  %v2279_v2 = vld [vmem:[%s3461_s1 + $0x10] sm:$0xff] }
   0x2   :  { %3477 = vst [vmem:[#allocation3_spill] sm:$0xff] %v2269_v0  ;;  %v2284_v3 = vld [vmem:[%s3461_s1 + $0x18] sm:$0x7]  ;;  %v2289_v4 = vld [vmem:[%s3462_s2] sm:$0x1]  ;;  %v2299_v6 = vld [vmem:[%s3463_s3 + $0x8] sm:$0xff] }
   0x3   :  { %3478 = vst [vmem:[#allocation4_spill] sm:$0xff] %v2274_v1  ;;  %v2294_v5 = vld [vmem:[%s3463_s3] sm:$0xff]  ;;  %v2304_v7 = vld [vmem:[%s3463_s3 + $0x10] sm:$0xff]  ;;  %v2309_v8 = vld [vmem:[%s3463_s3 + $0x18] sm:$0xff]  ;;  %s2546_s1 = smov 0  }
   0x4   :  { %3479 = vst [vmem:[#allocation5_spill] sm:$0xff] %v2279_v2  ;;  %v2314_v9 = vld [vmem:[%s3463_s3 + $0x20] sm:$0xff]  ;;  %v2319_v10 = vld [vmem:[%s3463_s3 + $0x28] sm:$0xff]  ;;  %v2324_v11 = vld [vmem:[%s3463_s3 + $0x30] sm:$0xff] }
   0x5   :  { %3480 = vst [vmem:[#allocation6_spill] sm:$0xff] %v2284_v3  ;;  %v2329_v12 = vld [vmem:[%s3463_s3 + $0x38] sm:$0xff]  ;;  %v2334_v13 = vld [vmem:[%s3463_s3 + $0x40] sm:$0xff]  ;;  %v2339_v14 = vld [vmem:[%s3463_s3 + $0x48] sm:$0xff] }
   0x6   :  { %3481 = vst [vmem:[#allocation7_spill] sm:$0xff] %v2294_v5  ;;  %v2344_v15 = vld [vmem:[%s3463_s3 + $0x50] sm:$0xff]  ;;  %v2349_v16 = vld [vmem:[%s3463_s3 + $0x58] sm:$0xff]  ;;  %v2354_v17 = vld [vmem:[%s3463_s3 + $0x60] sm:$0xff] }
   0x7   :  { %3482 = vst [vmem:[#allocation8_spill] sm:$0xff] %v2299_v6  ;;  %v2359_v18 = vld [vmem:[%s3463_s3 + $0x68] sm:$0xff]  ;;  %v2364_v19 = vld [vmem:[%s3463_s3 + $0x70] sm:$0xff]  ;;  %v2369_v20 = vld [vmem:[%s3463_s3 + $0x78] sm:$0xff] }
   0x8   :  { %3483 = vst [vmem:[#allocation9_spill] sm:$0xff] %v2304_v7  ;;  %v2374_v21 = vld [vmem:[%s3463_s3 + $0x80] sm:$0xff]  ;;  %v2379_v22 = vld [vmem:[%s3463_s3 + $0x88] sm:$0xff]  ;;  %v2384_v23 = vld [vmem:[%s3463_s3 + $0x90] sm:$0xff] }
   0x9   :  { %3484 = vst [vmem:[#allocation10_spill] sm:$0xff] %v2309_v8  ;;  %v2389_v24 = vld [vmem:[%s3463_s3 + $0x98] sm:$0xff]  ;;  %v2394_v25 = vld [vmem:[%s3463_s3 + $0xa0] sm:$0xff]  ;;  %v2399_v26 = vld [vmem:[%s3463_s3 + $0xa8] sm:$0xff] }
   0xa   :  { %3485 = vst [vmem:[#allocation11_spill] sm:$0xff] %v2314_v9  ;;  %v2404_v27 = vld [vmem:[%s3463_s3 + $0xb0] sm:$0xff]  ;;  %v2409_v28 = vld [vmem:[%s3463_s3 + $0xb8] sm:$0xff]  ;;  %v2414_v29 = vld [vmem:[%s3463_s3 + $0xc0] sm:$0xff] }
   0xb   :  { %3486 = vst [vmem:[#allocation12_spill] sm:$0xff] %v2319_v10  ;;  %v2419_v30 = vld [vmem:[%s3463_s3 + $0xc8] sm:$0xff]  ;;  %v2424_v31 = vld [vmem:[%s3463_s3 + $0xd0] sm:$0xff]  ;;  %v2429_v32 = vld [vmem:[%s3463_s3 + $0xd8] sm:$0xff] }
   0xc   :  { %3487 = vst [vmem:[#allocation13_spill] sm:$0xff] %v2324_v11  ;;  %v2434_v33 = vld [vmem:[%s3463_s3 + $0xe0] sm:$0xff]  ;;  %v2439_v34 = vld [vmem:[%s3463_s3 + $0xe8] sm:$0xff]  ;;  %v2444_v35 = vld [vmem:[%s3463_s3 + $0xf0] sm:$0xff] }
   0xd   :  { %3488 = vst [vmem:[#allocation14_spill] sm:$0xff] %v2329_v12  ;;  %v2449_v36 = vld [vmem:[%s3463_s3 + $0xf8] sm:$0xff]  ;;  %v2454_v37 = vld [vmem:[%s3463_s3 + $0x100] sm:$0xff]  ;;  %v2459_v38 = vld [vmem:[%s3463_s3 + $0x108] sm:$0xff] }
   0xe   :  { %3489 = vst [vmem:[#allocation15_spill] sm:$0xff] %v2334_v13  ;;  %v2464_v39 = vld [vmem:[%s3463_s3 + $0x110] sm:$0xff]  ;;  %v2469_v40 = vld [vmem:[%s3463_s3 + $0x118] sm:$0xff]  ;;  %v2474_v41 = vld [vmem:[%s3465_s4] sm:$0x1] }
   0xf   :  { %3490 = vst [vmem:[#allocation16_spill] sm:$0xff] %v2339_v14  ;;  %v2479_v42 = vld [vmem:[%s3466_s5] sm:$0xff]  ;;  %v2484_v43 = vld [vmem:[%s3466_s5 + $0x8] sm:$0xff]  ;;  %v2489_v44 = vld [vmem:[%s3466_s5 + $0x10] sm:$0xff] }
  0x10   :  { %3491 = vst [vmem:[#allocation17_spill] sm:$0xff] %v2344_v15  ;;  %v2494_v45 = vld [vmem:[%s3466_s5 + $0x18] sm:$0xff]  ;;  %v2499_v46 = vld [vmem:[%s3466_s5 + $0x20] sm:$0xff]  ;;  %v2504_v47 = vld [vmem:[%s3466_s5 + $0x28] sm:$0xff] }
  0x11   :  { %3492 = vst [vmem:[#allocation18_spill] sm:$0xff] %v2349_v16  ;;  %v2509_v48 = vld [vmem:[%s3466_s5 + $0x30] sm:$0xff]  ;;  %v2514_v49 = vld [vmem:[%s3466_s5 + $0x38] sm:$0xff]  ;;  %v2519_v50 = vld [vmem:[%s3467_s6] sm:$0x1] }
  0x12   :  { %3493 = vst [vmem:[#allocation19_spill] sm:$0xff] %v2354_v17  ;;  %v2524_v51 = vld [vmem:[%s3468_s7] sm:$0xff]  ;;  %v2529_v52 = vld [vmem:[%s3468_s7 + $0x8] sm:$0xff]  ;;  %v2534_v53 = vld [vmem:[%s3468_s7 + $0x10] sm:$0xff] }
  0x13   :  { %3494 = vst [vmem:[#allocation20_spill] sm:$0xff] %v2359_v18  ;;  %v2539_v54 = vld [vmem:[%s3468_s7 + $0x18] sm:$0xff]  ;;  %v2544_v55 = vld [vmem:[%s3469_s8] sm:$0x1] }
  0x14   :  { %3495 = vst [vmem:[#allocation21_spill] sm:$0xff] %v2364_v19 }
  0x15   :  { %3496 = vst [vmem:[#allocation22_spill] sm:$0xff] %v2369_v20 }
  0x16   :  { %3497 = vst [vmem:[#allocation23_spill] sm:$0xff] %v2374_v21 }
  0x17   :  { %3498 = vst [vmem:[#allocation24_spill] sm:$0xff] %v2379_v22 }
  0x18   :  { %3499 = vst [vmem:[#allocation25_spill] sm:$0xff] %v2384_v23 }
  0x19   :  { %3500 = vst [vmem:[#allocation26_spill] sm:$0xff] %v2389_v24 }
  0x1a   :  { %3501 = vst [vmem:[#allocation27_spill] sm:$0xff] %v2394_v25 }
  0x1b   :  { %3502 = vst [vmem:[#allocation28_spill] sm:$0xff] %v2399_v26 }
  0x1c   :  { %3503 = vst [vmem:[#allocation29_spill] sm:$0xff] %v2404_v27 }
  0x1d   :  { %3504 = vst [vmem:[#allocation30_spill] sm:$0xff] %v2409_v28 }
  0x1e   :  { %3505 = vst [vmem:[#allocation31_spill] sm:$0xff] %v2414_v29 }
  0x1f   :  { %3506 = vst [vmem:[#allocation32_spill] sm:$0xff] %v2419_v30 }
  0x20   :  { %3507 = vst [vmem:[#allocation33_spill] sm:$0xff] %v2424_v31 }
  0x21   :  { %3508 = vst [vmem:[#allocation34_spill] sm:$0xff] %v2429_v32 }
  0x22   :  { %3509 = vst [vmem:[#allocation35_spill] sm:$0xff] %v2434_v33 }
  0x23   :  { %3510 = vst [vmem:[#allocation36_spill] sm:$0xff] %v2439_v34 }
  0x24   :  { %3511 = vst [vmem:[#allocation37_spill] sm:$0xff] %v2444_v35 }
  0x25   :  { %3512 = vst [vmem:[#allocation38_spill] sm:$0xff] %v2449_v36 }
  0x26   :  { %3513 = vst [vmem:[#allocation39_spill] sm:$0xff] %v2454_v37 }
  0x27   :  { %3514 = vst [vmem:[#allocation40_spill] sm:$0xff] %v2459_v38 }
  0x28   :  { %3515 = vst [vmem:[#allocation41_spill] sm:$0xff] %v2464_v39 }
  0x29   :  { %3516 = vst [vmem:[#allocation42_spill] sm:$0xff] %v2469_v40 }
  0x2a   :  { %3517 = vst [vmem:[#allocation43_spill] sm:$0xff] %v2474_v41 }
  0x2b   :  { %3518 = vst [vmem:[#allocation44_spill] sm:$0xff] %v2479_v42 }
  0x2c   :  { %3519 = vst [vmem:[#allocation45_spill] sm:$0xff] %v2484_v43 }
  0x2d   :  { %3520 = vst [vmem:[#allocation46_spill] sm:$0xff] %v2489_v44 }
  0x2e   :  { %3521 = vst [vmem:[#allocation47_spill] sm:$0xff] %v2494_v45 }
  0x2f   :  { %3522 = vst [vmem:[#allocation48_spill] sm:$0xff] %v2499_v46 }
  0x30   :  { %3523 = vst [vmem:[#allocation49_spill] sm:$0xff] %v2504_v47 }
  0x31   :  { %3524 = vst [vmem:[#allocation50_spill] sm:$0xff] %v2509_v48 }
  0x32   :  { %3525 = vst [vmem:[#allocation51_spill] sm:$0xff] %v2514_v49 }
  0x33   :  { %3526 = vst [vmem:[#allocation52_spill] sm:$0xff] %v2519_v50 }
  0x34   :  { %3527 = vst [vmem:[#allocation53_spill] sm:$0xff] %v2524_v51 }
  0x35   :  { %3528 = vst [vmem:[#allocation54_spill] sm:$0xff] %v2529_v52 }
  0x36   :  { %3529 = vst [vmem:[#allocation55_spill] sm:$0xff] %v2534_v53 }
  0x37   :  { %3530 = vst [vmem:[#allocation56_spill] sm:$0xff] %v2539_v54 }
  0x38   :  { %3531 = vst [vmem:[#allocation57_spill] sm:$0xff] %v2544_v55 }
  0x39 LB: > { %v3532_v2 = vld [vmem:[#allocation5_spill] sm:$0xff]  ;;  %v3533_v1 = vld [vmem:[#allocation4_spill] sm:$0xff]  ;;  %v3534_v0 = vld [vmem:[#allocation3_spill] sm:$0xff]  ;;  %vm169_vm0 = vcmask 1042432   ;;  %vm313_vm1 = vcmask 1041408   ;;  %s94_s7 = smul.u32 144, %s2214_s1  ;;  %s1970_s3 = scalar_lea.vmem %s3464_s9, %s2214_s1  ;;  %s2214_s1 = sphi %s2546_s1, %s93_s1  }
  0x3a   : > { %v459_v56 = vrot.slane %v3533_v1, 4  ;;  %v241_v57 = vrot.slane %v3534_v0, 3  ;;  %1984 = vmatpush.msk.msra.mxu0 %vm169_vm0, %v3534_v0  ;;  %2193 = vmatpush.msk.msra.mxu1 %vm169_vm0, %v3534_v0  ;;  %v314_v58 = vrot.slane %v3534_v0, 6  ;;  %v315_v59 = vrot.slane %v3533_v1, 6  ;;  %v3535_v3 = vld [vmem:[#allocation6_spill] sm:$0xff]  ;;  %v3538_v11 = vld [vmem:[#allocation13_spill] sm:$0xff] }
  0x3b   : > { %v387_v60 = vrot.slane %v3533_v1, 1  ;;  %2194 = vmatpush.msk.msra.mxu2 %vm169_vm0, %v3534_v0  ;;  %2195 = vmatpush.msk.msra.mxu3 %vm169_vm0, %v3534_v0  ;;  %vm114_vm2 = vcmask 23552   ;;  %s2571_s2 = scalar_lea.vmem %s3460_s0, %s94_s7  ;;  %v678_v43 = vrot.slane %v3532_v2, 5  ;;  %v607_v44 = vrot.slane %v3532_v2, 2  ;;  %v3536_v12 = vld [vmem:[#allocation14_spill] sm:$0xff]  ;;  %v3539_v15 = vld [vmem:[#allocation17_spill] sm:$0xff] }
  0x3c   : > { %2060 = vmatpush.msk.msrb.mxu0 %vm169_vm0, %v459_v56  ;;  %2003 = vmatpush.msk.msrb.mxu1 %vm169_vm0, %v241_v57  ;;  %v316_v61 = vsel %vm313_vm1, %v314_v58, %v315_v59  ;;  %v2576_v62 = vld [vmem:[%s2571_s2] sm:$0xff]  ;;  %v2579_v63 = vld [vmem:[%s2571_s2 + $0x70] sm:$0xff]  ;;  %v2582_v56 = vld [vmem:[%s2571_s2 + $0x78] sm:$0xff]  ;;  %vm532_vm3 = vcmask 1040384   ;;  %vm822_vm4 = vcmask 1046528   ;;  %vm832_vm5 = vcmask 1045504  }
  0x3d   : > { %2022 = vmatpush.msk.msrb.mxu2 %vm169_vm0, %v316_v61  ;;  %2041 = vmatpush.msk.msrb.mxu3 %vm169_vm0, %v387_v60  ;;  %v2589_v57 = vld [vmem:[%s2571_s2 + $0x80] sm:$0xff]  ;;  %v2598_v58 = vld [vmem:[%s2571_s2 + $0x8] sm:$0xff]  ;;  %v2612_v60 = vld [vmem:[%s2571_s2 + $0x10] sm:$0xff]  ;;  %vm842_vm6 = vcmask 1043456   ;;  %vm1465_vm7 = vcmask 253952   ;;  %vm1467_vm8 = vcmask 256002  }
  0x3e   : > { %1985 = vmatmul.msk.f32.vlgmr.msra.gmra.mxu0 %vm114_vm2, %v2576_v62  ;;  %1999 = vmatmul.msk.f32.vlgmr.msra.gmra.mxu1 %vm114_vm2, %v2579_v63  ;;  %v2601_v59 = vld [vmem:[%s2571_s2 + $0x88] sm:$0xff]  ;;  %v2623_v61 = vld [vmem:[%s2571_s2 + $0x18] sm:$0xff]  ;;  %v2634_v0 = vld [vmem:[%s2571_s2 + $0x20] sm:$0xff]  ;;  %vm1469_vm9 = vcmask 258052   ;;  %vm1471_vm10 = vcmask 260102   ;;  %vm1570_vm11 = vcmask 261120  }
  0x3f   : > { %2000 = vmatmul.msk.f32.vlgmr.msra.gmra.mxu2 %vm114_vm2, %v2582_v56  ;;  %2001 = vmatmul.msk.f32.vlgmr.msra.gmra.mxu3 %vm114_vm2, %v2589_v57  ;;  %v2656_v55 = vld [vmem:[%s2571_s2 + $0x30] sm:$0xff]  ;;  %v2667_v50 = vld [vmem:[%s2571_s2 + $0x38] sm:$0xff]  ;;  %v2678_v41 = vld [vmem:[%s2571_s2 + $0x40] sm:$0xff]  ;;  %vm1909_vm12 = vcmask 523264   ;;  %vm1957_vm13 = vcmask 73728   ;;  %s93_s1 = sadd.s32 1, %s2214_s1  }
  0x40   : > { %2136 = vmatpush.msk.msra.mxu0 %vm169_vm0, %v3535_v3  ;;  %v2645_v3 = vld [vmem:[%s2571_s2 + $0x28] sm:$0xff]  ;;  %2117 = vmatpush.msk.msra.mxu3 %vm169_vm0, %v678_v43  ;;  %v3537_v16 = vld [vmem:[#allocation18_spill] sm:$0xff]  ;;  %v2706_v51 = vld [vmem:[%s2571_s2 + $0x50] sm:$0xff]  ;;  %v533_v43 = vrot.slane %v3533_v1, 7  ;;  %p90_p0 = scmp.ge.s32.totalorder %s93_s1, 8  }
  0x41   : > { %v2689_v42 = vld [vmem:[%s2571_s2 + $0x48] sm:$0xff]  ;;  %2098 = vmatpush.msk.msra.mxu2 %vm169_vm0, %v607_v44  ;;  %v534_v44 = vrot.slane %v3532_v2, 7  ;;  %v3542_v9 = vld [vmem:[#allocation11_spill] sm:$0xff]  ;;  %v3543_v8 = vld [vmem:[#allocation10_spill] sm:$0xff] }
  0x42   : > { %v3540_v10 = vld [vmem:[#allocation12_spill] sm:$0xff]  ;;  %v3544_v13 = vld [vmem:[#allocation15_spill] sm:$0xff]  ;;  %v3545_v7 = vld [vmem:[#allocation9_spill] sm:$0xff] }
  0x43   : > { %v3541_v14 = vld [vmem:[#allocation16_spill] sm:$0xff]  ;;  %v3547_v5 = vld [vmem:[#allocation7_spill] sm:$0xff]  ;;  %v3548_v24 = vld [vmem:[#allocation26_spill] sm:$0xff] }
  0x44   : > { %v3546_v6 = vld [vmem:[#allocation8_spill] sm:$0xff]  ;;  %v3549_v20 = vld [vmem:[#allocation22_spill] sm:$0xff]  ;;  %v3550_v23 = vld [vmem:[#allocation25_spill] sm:$0xff] }
  0x45   : > { %v3551_v19 = vld [vmem:[#allocation21_spill] sm:$0xff]  ;;  %v3552_v22 = vld [vmem:[#allocation24_spill] sm:$0xff]  ;;  %v3554_v28 = vld [vmem:[#allocation30_spill] sm:$0xff] }
  0x46   : > { %1986 = vmatmul.msk.f32.gmra.mxu0 %vm114_vm2, %v2598_v58  ;;  %2004 = vmatmul.msk.f32.vlgmr.msrb.gmra.mxu1 %vm114_vm2, %v2576_v62  ;;  %v3553_v18 = vld [vmem:[#allocation20_spill] sm:$0xff]  ;;  %v3555_v21 = vld [vmem:[#allocation23_spill] sm:$0xff]  ;;  %v3557_v27 = vld [vmem:[#allocation29_spill] sm:$0xff] }
  0x47   : > { %2002 = vmatmul.msk.f32.gmra.mxu3 %vm114_vm2, %v2601_v59  ;;  %2023 = vmatmul.msk.f32.vlgmr.msrb.gmra.mxu2 %vm114_vm2, %v2576_v62  ;;  %v3556_v17 = vld [vmem:[#allocation19_spill] sm:$0xff]  ;;  %v3558_v26 = vld [vmem:[#allocation28_spill] sm:$0xff] }
  0x48   : > { %1621 = vmatpush.msrb.mxu2 %v3536_v12  ;;  %v2726_v12 = vld [vmem:[%s2571_s2 + $0x58] sm:$0xff]  ;;  %v3559_v25 = vld [vmem:[#allocation27_spill] sm:$0xff] }
  0x4a   : > { %1622 = vmatpush.msrb.mxu2 %v3538_v11  ;;  %v535_v11 = vsel %vm532_vm3, %v533_v43, %v534_v44  ;;  %v2753_v43 = vld [vmem:[%s2571_s2 + $0x68] sm:$0xff] }
  0x4b   : > { %2079 = vmatpush.msk.msra.mxu1 %vm169_vm0, %v535_v11  ;;  %v2742_v11 = vld [vmem:[%s2571_s2 + $0x60] sm:$0xff] }
  0x4c   : > { %1623 = vmatpush.msrb.mxu2 %v3540_v10 }
  0x4d   : > { %1595 = vmatpush.msrb.mxu1 %v3543_v8 }
  0x4e   : > { %1987 = vmatmul.msk.f32.gmra.mxu0 %vm114_vm2, %v2612_v60  ;;  %2005 = vmatmul.msk.f32.gmra.mxu1 %vm114_vm2, %v2598_v58 }
  0x4f   : > { %2024 = vmatmul.msk.f32.gmra.mxu2 %vm114_vm2, %v2598_v58  ;;  %2042 = vmatmul.msk.f32.vlgmr.msrb.gmra.mxu3 %vm114_vm2, %v2576_v62 }
  0x50   : > { %1648 = vmatpush.msrb.mxu3 %v3537_v16  ;;  %1624 = vmatpush.msrb.mxu2 %v3542_v9 }
  0x51   : > { %1596 = vmatpush.msrb.mxu1 %v3545_v7 }
  0x52   : > { %1649 = vmatpush.msrb.mxu3 %v3539_v15 }
  0x53   : > { %1597 = vmatpush.msrb.mxu1 %v3546_v6 }
  0x54   : > { %1650 = vmatpush.msrb.mxu3 %v3541_v14 }
  0x55   : > { %1598 = vmatpush.msrb.mxu1 %v3547_v5 }
  0x56   : > { %1988 = vmatmul.msk.f32.gmra.mxu0 %vm114_vm2, %v2623_v61  ;;  %2006 = vmatmul.msk.f32.gmra.mxu1 %vm114_vm2, %v2612_v60 }
  0x57   : > { %2025 = vmatmul.msk.f32.gmra.mxu2 %vm114_vm2, %v2612_v60  ;;  %2043 = vmatmul.msk.f32.gmra.mxu3 %vm114_vm2, %v2598_v58 }
  0x58   : > { %1651 = vmatpush.msrb.mxu3 %v3544_v13 }
  0x5e   : > { %1989 = vmatmul.msk.f32.gmra.mxu0 %vm114_vm2, %v2634_v0  ;;  %2007 = vmatmul.msk.f32.gmra.mxu1 %vm114_vm2, %v2623_v61 }
  0x5f   : > { %2026 = vmatmul.msk.f32.gmra.mxu2 %vm114_vm2, %v2623_v61  ;;  %2044 = vmatmul.msk.f32.gmra.mxu3 %vm114_vm2, %v2612_v60 }
  0x66   : > { %1990 = vmatmul.msk.f32.gmra.mxu0 %vm114_vm2, %v2645_v3  ;;  %2008 = vmatmul.msk.f32.gmra.mxu1 %vm114_vm2, %v2634_v0 }
  0x67   : > { %2027 = vmatmul.msk.f32.gmra.mxu2 %vm114_vm2, %v2634_v0  ;;  %2045 = vmatmul.msk.f32.gmra.mxu3 %vm114_vm2, %v2623_v61 }
  0x6e   : > { %1991 = vmatmul.msk.f32.gmra.mxu0 %vm114_vm2, %v2656_v55  ;;  %2009 = vmatmul.msk.f32.gmra.mxu1 %vm114_vm2, %v2645_v3 }
  0x6f   : > { %2028 = vmatmul.msk.f32.gmra.mxu2 %vm114_vm2, %v2645_v3  ;;  %2046 = vmatmul.msk.f32.gmra.mxu3 %vm114_vm2, %v2634_v0 }
  0x76   : > { %1992 = vmatmul.msk.f32.gmra.mxu0 %vm114_vm2, %v2667_v50  ;;  %2010 = vmatmul.msk.f32.gmra.mxu1 %vm114_vm2, %v2656_v55 }
  0x77   : > { %2029 = vmatmul.msk.f32.gmra.mxu2 %vm114_vm2, %v2656_v55  ;;  %2047 = vmatmul.msk.f32.gmra.mxu3 %vm114_vm2, %v2645_v3 }
  0x7e   : > { %1993 = vmatmul.msk.f32.gmra.mxu0 %vm114_vm2, %v2678_v41  ;;  %2011 = vmatmul.msk.f32.gmra.mxu1 %vm114_vm2, %v2667_v50 }
  0x7f   : > { %2030 = vmatmul.msk.f32.gmra.mxu2 %vm114_vm2, %v2667_v50  ;;  %2048 = vmatmul.msk.f32.gmra.mxu3 %vm114_vm2, %v2656_v55 }
  0x86   : > { %1994 = vmatmul.msk.f32.gmra.mxu0 %vm114_vm2, %v2689_v42  ;;  %2012 = vmatmul.msk.f32.gmra.mxu1 %vm114_vm2, %v2678_v41 }
  0x87   : > { %2031 = vmatmul.msk.f32.gmra.mxu2 %vm114_vm2, %v2678_v41  ;;  %2049 = vmatmul.msk.f32.gmra.mxu3 %vm114_vm2, %v2667_v50 }
  0x8e   : > { %1995 = vmatmul.msk.f32.gmra.mxu0 %vm114_vm2, %v2706_v51  ;;  %2013 = vmatmul.msk.f32.gmra.mxu1 %vm114_vm2, %v2689_v42 }
  0x8f   : > { %2032 = vmatmul.msk.f32.gmra.mxu2 %vm114_vm2, %v2689_v42  ;;  %2050 = vmatmul.msk.f32.gmra.mxu3 %vm114_vm2, %v2678_v41 }
  0x96   : > { %1996 = vmatmul.msk.f32.gmra.mxu0 %vm114_vm2, %v2726_v12  ;;  %2014 = vmatmul.msk.f32.gmra.mxu1 %vm114_vm2, %v2706_v51 }
  0x97   : > { %2033 = vmatmul.msk.f32.gmra.mxu2 %vm114_vm2, %v2706_v51  ;;  %2051 = vmatmul.msk.f32.gmra.mxu3 %vm114_vm2, %v2689_v42 }
  0x9e   : > { %1997 = vmatmul.msk.f32.gmra.mxu0 %vm114_vm2, %v2742_v11  ;;  %2015 = vmatmul.msk.f32.gmra.mxu1 %vm114_vm2, %v2726_v12 }
  0x9f   : > { %2034 = vmatmul.msk.f32.gmra.mxu2 %vm114_vm2, %v2726_v12  ;;  %2052 = vmatmul.msk.f32.gmra.mxu3 %vm114_vm2, %v2706_v51 }
  0xa6   : > { %1998 = vmatmul.msk.f32.gmra.mxu0 %vm114_vm2, %v2753_v43  ;;  %2016 = vmatmul.msk.f32.gmra.mxu1 %vm114_vm2, %v2742_v11 }
  0xa7   : > { %2035 = vmatmul.msk.f32.gmra.mxu2 %vm114_vm2, %v2742_v11  ;;  %2053 = vmatmul.msk.f32.gmra.mxu3 %vm114_vm2, %v2726_v12 }
  0xae   : > { %2017 = vmatmul.msk.f32.gmra.mxu1 %vm114_vm2, %v2753_v43  ;;  %2061 = vmatmul.msk.f32.vlgmr.msrb.gmra.mxu0 %vm114_vm2, %v2576_v62 }
  0xaf   : > { %2036 = vmatmul.msk.f32.gmra.mxu2 %vm114_vm2, %v2753_v43  ;;  %2054 = vmatmul.msk.f32.gmra.mxu3 %vm114_vm2, %v2742_v11 }
  0xb6   : > { %2018 = vmatmul.msk.f32.gmra.mxu1 %vm114_vm2, %v2579_v63  ;;  %2062 = vmatmul.msk.f32.gmra.mxu0 %vm114_vm2, %v2598_v58 }
  0xb7   : > { %2037 = vmatmul.msk.f32.gmra.mxu2 %vm114_vm2, %v2579_v63  ;;  %2055 = vmatmul.msk.f32.gmra.mxu3 %vm114_vm2, %v2753_v43 }
  0xbb   : > { %v190_v44 = vpop.f32.mrf.mxu0  ;;  %v2779_v1 = vpop.f32.mrf.mxu1 }
  0xbe   : > { %2019 = vmatmul.msk.f32.gmra.mxu1 %vm114_vm2, %v2582_v56  ;;  %2063 = vmatmul.msk.f32.gmra.mxu0 %vm114_vm2, %v2612_v60 }
  0xbf   : > { %2038 = vmatmul.msk.f32.gmra.mxu2 %vm114_vm2, %v2582_v56  ;;  %2056 = vmatmul.msk.f32.gmra.mxu3 %vm114_vm2, %v2579_v63 }
  0xc2   : > { %v235_v2 = vpop.f32.mrf.mxu2  ;;  %v237_v5 = vpop.f32.mrf.mxu3 }
  0xc3   : > { %v193_v6 = vpop.f32.mrf.mxu0  ;;  %v261_v7 = vpop.f32.mrf.mxu1 }
  0xc4   : > { %v823_v2 = vrot.slane %v261_v7, 1 }
  0xc6   : > { %2020 = vmatmul.msk.f32.gmra.mxu1 %vm114_vm2, %v2589_v57  ;;  %2064 = vmatmul.msk.f32.gmra.mxu0 %vm114_vm2, %v2623_v61 }
  0xc7   : > { %2039 = vmatmul.msk.f32.gmra.mxu2 %vm114_vm2, %v2589_v57  ;;  %2057 = vmatmul.msk.f32.gmra.mxu3 %vm114_vm2, %v2582_v56 }
  0xca   : > { %v239_v8 = vpop.f32.mrf.mxu3  ;;  %v336_v9 = vpop.f32.mrf.mxu2 }
  0xcb   : > { %v196_v10 = vpop.f32.mrf.mxu0  ;;  %v264_v13 = vpop.f32.mrf.mxu1  ;;  %v833_v14 = vrot.slane %v336_v9, 2 }
  0xcc   : > { %v824_v5 = vrot.slane %v264_v13, 1 }
  0xce   : > { %2021 = vmatmul.msk.f32.gmra.mxu1 %vm114_vm2, %v2601_v59  ;;  %2065 = vmatmul.msk.f32.gmra.mxu0 %vm114_vm2, %v2634_v0  ;;  %v825_v8 = vsel %vm822_vm4, %v823_v2, %v824_v5  ;;  %v829_v13 = vadd.f32 %v824_v5, %v193_v6 }
  0xcf   : > { %2040 = vmatmul.msk.f32.gmra.mxu2 %vm114_vm2, %v2601_v59  ;;  %2058 = vmatmul.msk.f32.gmra.mxu3 %vm114_vm2, %v2589_v57  ;;  %v828_v52 = vadd.f32 %v825_v8, %v190_v44 }
  0xd2   : > { %v339_v15 = vpop.f32.mrf.mxu2  ;;  %v407_v7 = vpop.f32.mrf.mxu3 }
  0xd3   : > { %v834_v16 = vrot.slane %v339_v15, 2  ;;  %v2806_v45 = vpop.f32.mrf.mxu0  ;;  %v267_v46 = vpop.f32.mrf.mxu1 }
  0xd4   : > { %v896_v53 = vrot.slane %v267_v46, 1 }
  0xd5   : > { %v835_v47 = vsel %vm832_vm5, %v833_v14, %v834_v16  ;;  %v839_v48 = vadd.f32 %v834_v16, %v829_v13 }
  0xd6   : > { %v838_v54 = vadd.f32 %v835_v47, %v828_v52  ;;  %2066 = vmatmul.msk.f32.gmra.mxu0 %vm114_vm2, %v2645_v3  ;;  %2080 = vmatmul.msk.f32.vlgmr.msra.gmra.mxu1 %vm114_vm2, %v2576_v62  ;;  %v897_v9 = vsel %vm822_vm4, %v824_v5, %v896_v53  ;;  %v901_v46 = vadd.f32 %v896_v53, %v196_v10 }
  0xd7   : > { %2059 = vmatmul.msk.f32.gmra.mxu3 %vm114_vm2, %v2601_v59  ;;  %2099 = vmatmul.msk.f32.vlgmr.msra.gmra.mxu2 %vm114_vm2, %v2576_v62  ;;  %v900_v2 = vadd.f32 %v897_v9, %v193_v6 }
  0xd8   : > { %1702 = vmatpush.msra.mxu2 %v3548_v24  ;;  %1675 = vmatpush.msra.mxu1 %v3549_v20 }
  0xda   : > { %v342_v14 = vpop.f32.mrf.mxu2  ;;  %v409_v15 = vpop.f32.mrf.mxu3  ;;  %1703 = vmatpush.msra.mxu2 %v3550_v23  ;;  %1676 = vmatpush.msra.mxu1 %v3551_v19 }
  0xdb   : > { %v903_v47 = vrot.slane %v342_v14, 2  ;;  %v202_v52 = vpop.f32.mrf.mxu0  ;;  %v270_v44 = vpop.f32.mrf.mxu1  ;;  %v843_v6 = vrot.slane %v409_v15, 4 }
  0xdc   : > { %1704 = vmatpush.msra.mxu2 %v3552_v22  ;;  %1677 = vmatpush.msra.mxu1 %v3553_v18  ;;  %v958_v14 = vrot.slane %v270_v44, 1 }
  0xdd   : > { %v904_v8 = vsel %vm832_vm5, %v834_v16, %v903_v47  ;;  %v908_v7 = vadd.f32 %v903_v47, %v901_v46 }
  0xde   : > { %2067 = vmatmul.msk.f32.gmra.mxu0 %vm114_vm2, %v2656_v55  ;;  %2081 = vmatmul.msk.f32.gmra.mxu1 %vm114_vm2, %v2598_v58  ;;  %v907_v5 = vadd.f32 %v904_v8, %v900_v2 }
  0xdf   : > { %2100 = vmatmul.msk.f32.gmra.mxu2 %vm114_vm2, %v2598_v58  ;;  %2118 = vmatmul.msk.f32.vlgmr.msra.gmra.mxu3 %vm114_vm2, %v2576_v62 }
  0xe0   : > { %1729 = vmatpush.msra.mxu3 %v3554_v28  ;;  %1705 = vmatpush.msra.mxu2 %v3555_v21 }
  0xe1   : > { %1678 = vmatpush.msra.mxu1 %v3556_v17 }
  0xe2   : > { %v345_v10 = vpop.f32.mrf.mxu2  ;;  %v412_v16 = vpop.f32.mrf.mxu3  ;;  %1730 = vmatpush.msra.mxu3 %v3557_v27 }
  0xe3   : > { %v844_v53 = vrot.slane %v412_v16, 4  ;;  %v205_v13 = vpop.f32.mrf.mxu0  ;;  %v273_v9 = vpop.f32.mrf.mxu1  ;;  %v967_v15 = vrot.slane %v345_v10, 2 }
  0xe4   : > { %1731 = vmatpush.msra.mxu3 %v3558_v26  ;;  %v959_v2 = vrot.slane %v273_v9, 1 }
  0xe5   : > { %v845_v46 = vsel %vm842_vm6, %v843_v6, %v844_v53  ;;  %v2839_v47 = vadd.f32 %v844_v53, %v839_v48 }
  0xe6   : > { %v2841_v8 = vadd.f32 %v845_v46, %v838_v54  ;;  %2068 = vmatmul.msk.f32.gmra.mxu0 %vm114_vm2, %v2667_v50  ;;  %2082 = vmatmul.msk.f32.gmra.mxu1 %vm114_vm2, %v2612_v60  ;;  %v960_v48 = vsel %vm822_vm4, %v958_v14, %v959_v2  ;;  %v964_v6 = vadd.f32 %v959_v2, %v202_v52 }
  0xe7   : > { %2101 = vmatmul.msk.f32.gmra.mxu2 %vm114_vm2, %v2612_v60  ;;  %2119 = vmatmul.msk.f32.gmra.mxu3 %vm114_vm2, %v2598_v58  ;;  %v963_v17 = vadd.f32 %v960_v48, %v2806_v45 }
  0xe8   : > { %1732 = vmatpush.msra.mxu3 %v3559_v25 }
  0xea   : > { %v348_v44 = vpop.f32.mrf.mxu2  ;;  %v415_v54 = vpop.f32.mrf.mxu3 }
  0xeb   : > { %v968_v16 = vrot.slane %v348_v44, 2  ;;  %v911_v53 = vrot.slane %v415_v54, 4  ;;  %v208_v9 = vpop.f32.mrf.mxu0  ;;  %v276_v46 = vpop.f32.mrf.mxu1 }
  0xec   : > { %v1020_v20 = vrot.slane %v276_v46, 1 }
  0xed   : > { %v969_v18 = vsel %vm832_vm5, %v967_v15, %v968_v16  ;;  %v2855_v19 = vadd.f32 %v911_v53, %v907_v5  ;;  %v973_v21 = vadd.f32 %v968_v16, %v964_v6 }
  0xee   : > { %v972_v22 = vadd.f32 %v969_v18, %v963_v17  ;;  %2069 = vmatmul.msk.f32.gmra.mxu0 %vm114_vm2, %v2678_v41  ;;  %2083 = vmatmul.msk.f32.gmra.mxu1 %vm114_vm2, %v2623_v61  ;;  %v1021_v45 = vsel %vm822_vm4, %v959_v2, %v1020_v20  ;;  %v1025_v14 = vadd.f32 %v1020_v20, %v205_v13 }
  0xef   : > { %2102 = vmatmul.msk.f32.gmra.mxu2 %vm114_vm2, %v2623_v61  ;;  %2120 = vmatmul.msk.f32.gmra.mxu3 %vm114_vm2, %v2612_v60  ;;  %v1024_v44 = vadd.f32 %v1021_v45, %v202_v52 }
  0xf2   : > { %v351_v10 = vpop.f32.mrf.mxu2  ;;  %v418_v5 = vpop.f32.mrf.mxu3 }
  0xf3   : > { %v1027_v15 = vrot.slane %v351_v10, 2  ;;  %v912_v48 = vrot.slane %v418_v5, 4  ;;  %v211_v17 = vpop.f32.mrf.mxu0  ;;  %v279_v18 = vpop.f32.mrf.mxu1 }
  0xf5   : > { %v1028_v54 = vsel %vm832_vm5, %v968_v16, %v1027_v15  ;;  %v1032_v6 = vadd.f32 %v1027_v15, %v1025_v14  ;;  %v913_v46 = vsel %vm842_vm6, %v911_v53, %v912_v48 }
  0xf6   : > { %v2868_v23 = vadd.f32 %v913_v46, %v908_v7  ;;  %2070 = vmatmul.msk.f32.gmra.mxu0 %vm114_vm2, %v2689_v42  ;;  %2084 = vmatmul.msk.f32.gmra.mxu1 %vm114_vm2, %v2634_v0  ;;  %v1031_v2 = vadd.f32 %v1028_v54, %v1024_v44  ;;  %v1082_v7 = vrot.slane %v279_v18, 1 }
  0xf7   : > { %2103 = vmatmul.msk.f32.gmra.mxu2 %vm114_vm2, %v2634_v0  ;;  %2121 = vmatmul.msk.f32.gmra.mxu3 %vm114_vm2, %v2623_v61 }
  0xfa   : > { %v354_v20 = vpop.f32.mrf.mxu2  ;;  %v421_v52 = vpop.f32.mrf.mxu3 }
  0xfb   : > { %v975_v13 = vrot.slane %v421_v52, 4  ;;  %v214_v16 = vpop.f32.mrf.mxu0  ;;  %v282_v53 = vpop.f32.mrf.mxu1  ;;  %v1091_v15 = vrot.slane %v354_v20, 2 }
  0xfc   : > { %v1083_v5 = vrot.slane %v282_v53, 1 }
  0xfd   : > { %v976_v45 = vsel %vm842_vm6, %v912_v48, %v975_v13  ;;  %v2879_v10 = vadd.f32 %v975_v13, %v973_v21 }
  0xfe   : > { %v2881_v14 = vadd.f32 %v976_v45, %v972_v22  ;;  %2071 = vmatmul.msk.f32.gmra.mxu0 %vm114_vm2, %v2706_v51  ;;  %2085 = vmatmul.msk.f32.gmra.mxu1 %vm114_vm2, %v2645_v3  ;;  %v1084_v48 = vsel %vm822_vm4, %v1082_v7, %v1083_v5  ;;  %v1088_v44 = vadd.f32 %v1083_v5, %v211_v17 }
  0xff   : > { %3560 = vst [vmem:[#allocation58_spill] sm:$0xff] %v2879_v10  ;;  %2104 = vmatmul.msk.f32.gmra.mxu2 %vm114_vm2, %v2645_v3  ;;  %2122 = vmatmul.msk.f32.gmra.mxu3 %vm114_vm2, %v2634_v0  ;;  %v1087_v13 = vadd.f32 %v1084_v48, %v208_v9 }
 0x100   : > { %3561 = vst [vmem:[#allocation59_spill] sm:$0xff] %v2881_v14 }
 0x102   : > { %v357_v21 = vpop.f32.mrf.mxu2  ;;  %v424_v18 = vpop.f32.mrf.mxu3 }
 0x103   : > { %v1092_v22 = vrot.slane %v357_v21, 2  ;;  %v1035_v54 = vrot.slane %v424_v18, 4  ;;  %v217_v46 = vpop.f32.mrf.mxu0  ;;  %v285_v52 = vpop.f32.mrf.mxu1 }
 0x104   : > { %v1144_v24 = vrot.slane %v285_v52, 1 }
 0x105   : > { %v1093_v53 = vsel %vm832_vm5, %v1091_v15, %v1092_v22  ;;  %v2893_v45 = vadd.f32 %v1035_v54, %v1031_v2  ;;  %v1097_v25 = vadd.f32 %v1092_v22, %v1088_v44 }
 0x106   : > { %v1096_v26 = vadd.f32 %v1093_v53, %v1087_v13  ;;  %2072 = vmatmul.msk.f32.gmra.mxu0 %vm114_vm2, %v2726_v12  ;;  %2086 = vmatmul.msk.f32.gmra.mxu1 %vm114_vm2, %v2656_v55  ;;  %v1145_v9 = vsel %vm822_vm4, %v1083_v5, %v1144_v24  ;;  %v1149_v7 = vadd.f32 %v1144_v24, %v214_v16 }
 0x107   : > { %3562 = vst [vmem:[#allocation60_spill] sm:$0xff] %v2893_v45  ;;  %2105 = vmatmul.msk.f32.gmra.mxu2 %vm114_vm2, %v2656_v55  ;;  %2123 = vmatmul.msk.f32.gmra.mxu3 %vm114_vm2, %v2645_v3  ;;  %v1148_v44 = vadd.f32 %v1145_v9, %v211_v17 }
 0x10a   : > { %v360_v20 = vpop.f32.mrf.mxu2  ;;  %v427_v2 = vpop.f32.mrf.mxu3 }
 0x10b   : > { %v1151_v15 = vrot.slane %v360_v20, 2  ;;  %v1036_v48 = vrot.slane %v427_v2, 4  ;;  %v220_v21 = vpop.f32.mrf.mxu0  ;;  %v288_v18 = vpop.f32.mrf.mxu1 }
 0x10c   : > { %v1206_v9 = vrot.slane %v288_v18, 1 }
 0x10d   : > { %v1152_v52 = vsel %vm832_vm5, %v1092_v22, %v1151_v15  ;;  %v1156_v13 = vadd.f32 %v1151_v15, %v1149_v7  ;;  %v1037_v53 = vsel %vm842_vm6, %v1035_v54, %v1036_v48 }
 0x10e   : > { %2073 = vmatmul.msk.f32.gmra.mxu0 %vm114_vm2, %v2742_v11  ;;  %2087 = vmatmul.msk.f32.gmra.mxu1 %vm114_vm2, %v2667_v50  ;;  %v1155_v5 = vadd.f32 %v1152_v52, %v1148_v44  ;;  %v2910_v27 = vadd.f32 %v1037_v53, %v1032_v6 }
 0x10f   : > { %2106 = vmatmul.msk.f32.gmra.mxu2 %vm114_vm2, %v2667_v50  ;;  %2124 = vmatmul.msk.f32.gmra.mxu3 %vm114_vm2, %v2656_v55 }
 0x112   : > { %v363_v24 = vpop.f32.mrf.mxu2  ;;  %v430_v17 = vpop.f32.mrf.mxu3 }
 0x113   : > { %v1099_v16 = vrot.slane %v430_v17, 4  ;;  %v223_v22 = vpop.f32.mrf.mxu0  ;;  %v291_v54 = vpop.f32.mrf.mxu1  ;;  %v1215_v15 = vrot.slane %v363_v24, 2 }
 0x114   : > { %v1207_v7 = vrot.slane %v291_v54, 1 }
 0x115   : > { %v1100_v20 = vsel %vm842_vm6, %v1036_v48, %v1099_v16  ;;  %v2917_v2 = vadd.f32 %v1099_v16, %v1097_v25 }
 0x116   : > { %2074 = vmatmul.msk.f32.gmra.mxu0 %vm114_vm2, %v2753_v43  ;;  %2088 = vmatmul.msk.f32.gmra.mxu1 %vm114_vm2, %v2678_v41  ;;  %v2923_v6 = vadd.f32 %v1100_v20, %v1096_v26  ;;  %v1208_v48 = vsel %vm822_vm4, %v1206_v9, %v1207_v7  ;;  %v1212_v44 = vadd.f32 %v1207_v7, %v220_v21 }
 0x117   : > { %2107 = vmatmul.msk.f32.gmra.mxu2 %vm114_vm2, %v2678_v41  ;;  %2125 = vmatmul.msk.f32.gmra.mxu3 %vm114_vm2, %v2667_v50  ;;  %v1211_v54 = vadd.f32 %v1208_v48, %v217_v46 }
 0x11a   : > { %v366_v25 = vpop.f32.mrf.mxu2  ;;  %v433_v18 = vpop.f32.mrf.mxu3 }
 0x11b   : > { %v1216_v52 = vrot.slane %v366_v25, 2  ;;  %v1159_v53 = vrot.slane %v433_v18, 4  ;;  %v2930_v17 = vpop.f32.mrf.mxu0  ;;  %v294_v16 = vpop.f32.mrf.mxu1 }
 0x11c   : > { %v1268_v28 = vrot.slane %v294_v16, 1 }
 0x11d   : > { %v1217_v26 = vsel %vm832_vm5, %v1215_v15, %v1216_v52  ;;  %v2933_v20 = vadd.f32 %v1159_v53, %v1155_v5  ;;  %v1221_v49 = vadd.f32 %v1216_v52, %v1212_v44 }
 0x11e   : > { %v1220_v29 = vadd.f32 %v1217_v26, %v1211_v54  ;;  %2075 = vmatmul.msk.f32.gmra.mxu0 %vm114_vm2, %v2579_v63  ;;  %2089 = vmatmul.msk.f32.gmra.mxu1 %vm114_vm2, %v2689_v42  ;;  %v1269_v46 = vsel %vm822_vm4, %v1207_v7, %v1268_v28  ;;  %v1273_v9 = vadd.f32 %v1268_v28, %v223_v22 }
 0x11f   : > { %2108 = vmatmul.msk.f32.gmra.mxu2 %vm114_vm2, %v2689_v42  ;;  %2126 = vmatmul.msk.f32.gmra.mxu3 %vm114_vm2, %v2678_v41  ;;  %v1272_v44 = vadd.f32 %v1269_v46, %v220_v21 }
 0x122   : > { %v369_v24 = vpop.f32.mrf.mxu2  ;;  %v436_v5 = vpop.f32.mrf.mxu3 }
 0x123   : > { %v1275_v15 = vrot.slane %v369_v24, 2  ;;  %v1160_v48 = vrot.slane %v436_v5, 4  ;;  %v2944_v25 = vpop.f32.mrf.mxu0  ;;  %v2946_v18 = vpop.f32.mrf.mxu1 }
 0x125   : > { %v1276_v16 = vsel %vm832_vm5, %v1216_v52, %v1275_v15  ;;  %v2949_v54 = vadd.f32 %v1275_v15, %v1273_v9  ;;  %v1161_v26 = vsel %vm842_vm6, %v1159_v53, %v1160_v48 }
 0x126   : > { %2076 = vmatmul.msk.f32.gmra.mxu0 %vm114_vm2, %v2582_v56  ;;  %2090 = vmatmul.msk.f32.gmra.mxu1 %vm114_vm2, %v2706_v51  ;;  %v2956_v28 = vadd.f32 %v1276_v16, %v1272_v44  ;;  %v2958_v22 = vadd.f32 %v1161_v26, %v1156_v13 }
 0x127   : > { %2109 = vmatmul.msk.f32.gmra.mxu2 %vm114_vm2, %v2706_v51  ;;  %2127 = vmatmul.msk.f32.gmra.mxu3 %vm114_vm2, %v2689_v42 }
 0x12a   : > { %v2964_v21 = vpop.f32.mrf.mxu2  ;;  %v439_v7 = vpop.f32.mrf.mxu3 }
 0x12b   : > { %v1223_v52 = vrot.slane %v439_v7, 4  ;;  %v2966_v53 = vpop.f32.mrf.mxu1  ;;  %v479_v46 = vpop.f32.mrf.mxu0 }
 0x12d   : > { %v1224_v24 = vsel %vm842_vm6, %v1160_v48, %v1223_v52  ;;  %v2969_v5 = vadd.f32 %v1223_v52, %v1221_v49 }
 0x12e   : > { %2077 = vmatmul.msk.f32.gmra.mxu0 %vm114_vm2, %v2589_v57  ;;  %2091 = vmatmul.msk.f32.gmra.mxu1 %vm114_vm2, %v2726_v12  ;;  %v2975_v13 = vadd.f32 %v1224_v24, %v1220_v29 }
 0x12f   : > { %2110 = vmatmul.msk.f32.gmra.mxu2 %vm114_vm2, %v2726_v12  ;;  %2128 = vmatmul.msk.f32.gmra.mxu3 %vm114_vm2, %v2706_v51 }
 0x132   : > { %v2981_v9 = vpop.f32.mrf.mxu2  ;;  %v2983_v15 = vpop.f32.mrf.mxu3 }
 0x133   : > { %v2985_v49 = vpop.f32.mrf.mxu1  ;;  %v2987_v48 = vpop.f32.mrf.mxu0 }
 0x136   : > { %2078 = vmatmul.msk.f32.gmra.mxu0 %vm114_vm2, %v2601_v59  ;;  %2092 = vmatmul.msk.f32.gmra.mxu1 %vm114_vm2, %v2742_v11 }
 0x137   : > { %2111 = vmatmul.msk.f32.gmra.mxu2 %vm114_vm2, %v2742_v11  ;;  %2129 = vmatmul.msk.f32.gmra.mxu3 %vm114_vm2, %v2726_v12 }
 0x13a   : > { %v2997_v29 = vpop.f32.mrf.mxu2  ;;  %v2999_v44 = vpop.f32.mrf.mxu3 }
 0x13b   : > { %v306_v16 = vpop.f32.mrf.mxu1  ;;  %v3001_v26 = vpop.f32.mrf.mxu0 }
 0x13e   : > { %2093 = vmatmul.msk.f32.gmra.mxu1 %vm114_vm2, %v2753_v43  ;;  %2137 = vmatmul.msk.f32.vlgmr.msra.gmra.mxu0 %vm114_vm2, %v2576_v62 }
 0x13f   : > { %2112 = vmatmul.msk.f32.gmra.mxu2 %vm114_vm2, %v2753_v43  ;;  %2130 = vmatmul.msk.f32.gmra.mxu3 %vm114_vm2, %v2742_v11 }
 0x142   : > { %v381_v7 = vpop.f32.mrf.mxu2  ;;  %v3011_v52 = vpop.f32.mrf.mxu3 }
 0x143   : > { %v308_v46 = vpop.f32.mrf.mxu1  ;;  %v3013_v24 = vpop.f32.mrf.mxu0 }
 0x146   : > { %2094 = vmatmul.msk.f32.gmra.mxu1 %vm114_vm2, %v2579_v63  ;;  %2138 = vmatmul.msk.f32.gmra.mxu0 %vm114_vm2, %v2598_v58 }
 0x147   : > { %2113 = vmatmul.msk.f32.gmra.mxu2 %vm114_vm2, %v2579_v63  ;;  %2131 = vmatmul.msk.f32.gmra.mxu3 %vm114_vm2, %v2753_v43 }
 0x14a   : > { %v383_v62 = vpop.f32.mrf.mxu2  ;;  %v3023_v16 = vpop.f32.mrf.mxu3 }
 0x14b   : > { %v310_v7 = vpop.f32.mrf.mxu1  ;;  %v3025_v37 = vpop.f32.mrf.mxu0 }
 0x14e   : > { %2095 = vmatmul.msk.f32.gmra.mxu1 %vm114_vm2, %v2582_v56  ;;  %2139 = vmatmul.msk.f32.gmra.mxu0 %vm114_vm2, %v2612_v60 }
 0x14f   : > { %2114 = vmatmul.msk.f32.gmra.mxu2 %vm114_vm2, %v2582_v56  ;;  %2132 = vmatmul.msk.f32.gmra.mxu3 %vm114_vm2, %v2579_v63 }
 0x152   : > { %v385_v58 = vpop.f32.mrf.mxu2  ;;  %v3035_v46 = vpop.f32.mrf.mxu3 }
 0x153   : > { %v3037_v62 = vpop.f32.mrf.mxu0  ;;  %v555_v7 = vpop.f32.mrf.mxu1 }
 0x156   : > { %2096 = vmatmul.msk.f32.gmra.mxu1 %vm114_vm2, %v2589_v57  ;;  %2140 = vmatmul.msk.f32.gmra.mxu0 %vm114_vm2, %v2623_v61 }
 0x157   : > { %2115 = vmatmul.msk.f32.gmra.mxu2 %vm114_vm2, %v2589_v57  ;;  %2133 = vmatmul.msk.f32.gmra.mxu3 %vm114_vm2, %v2582_v56 }
 0x15a   : > { %v457_v60 = vpop.f32.mrf.mxu3  ;;  %v627_v33 = vpop.f32.mrf.mxu2 }
 0x15b   : > { %v3047_v58 = vpop.f32.mrf.mxu0  ;;  %v3049_v30 = vpop.f32.mrf.mxu1 }
 0x15c   : > { %3563 = vst [vmem:[#allocation61_spill] sm:$0xff] %v3047_v58  ;;  %v3473_v32 = vrot.slane %v3047_v58, 5 }
 0x15e   : > { %2141 = vmatmul.msk.f32.gmra.mxu0 %vm114_vm2, %v2634_v0  ;;  %2097 = vmatmul.msk.f32.gmra.mxu1 %vm114_vm2, %v2601_v59 }
 0x15f   : > { %2116 = vmatmul.msk.f32.gmra.mxu2 %vm114_vm2, %v2601_v59  ;;  %2134 = vmatmul.msk.f32.gmra.mxu3 %vm114_vm2, %v2589_v57 }
 0x162   : > { %v629_v61 = vpop.f32.mrf.mxu2  ;;  %v698_v7 = vpop.f32.mrf.mxu3 }
 0x163   : > { %v499_v60 = vpop.f32.mrf.mxu0  ;;  %v3059_v33 = vpop.f32.mrf.mxu1 }
 0x166   : > { %2142 = vmatmul.msk.f32.gmra.mxu0 %vm114_vm2, %v2645_v3 }
 0x167   : > { %2135 = vmatmul.msk.f32.gmra.mxu3 %vm114_vm2, %v2601_v59 }
 0x16a   : > { %v631_v0 = vpop.f32.mrf.mxu2  ;;  %v700_v38 = vpop.f32.mrf.mxu3 }
 0x16b   : > { %v502_v34 = vpop.f32.mrf.mxu0  ;;  %v3065_v31 = vpop.f32.mrf.mxu1 }
 0x16e   : > { %2143 = vmatmul.msk.f32.gmra.mxu0 %vm114_vm2, %v2656_v55  ;;  %v1045_v55 = vrot.slane %v499_v60, 5 }
 0x172   : > { %v702_v39 = vpop.f32.mrf.mxu3 }
 0x173   : > { %v3069_v61 = vpop.f32.mrf.mxu0  ;;  %v3071_v7 = vpop.f32.mrf.mxu1  ;;  %v1283_v39 = vrot.slane %v2983_v15, 4 }
 0x176   : > { %2144 = vmatmul.msk.f32.gmra.mxu0 %vm114_vm2, %v2667_v50  ;;  %v1046_v50 = vsel %vm169_vm0, %v3473_v32, %v1045_v55 }
 0x177   : > { %v1050_v60 = vadd.f32 %v1046_v50, %v2910_v27 }
 0x17b   : > { %v3075_v3 = vpop.f32.mrf.mxu0  ;;  %v3077_v35 = vpop.f32.mrf.mxu1 }
 0x17c   : > { %3564 = vst [vmem:[#allocation62_spill] sm:$0xff] %v3077_v35  ;;  %v1106_v35 = vrot.slane %v502_v34, 5  ;;  %v1339_v34 = vrot.slane %v2964_v21, 2 }
 0x17e   : > { %2145 = vmatmul.msk.f32.gmra.mxu0 %vm114_vm2, %v2678_v41  ;;  %v1288_v41 = vadd.f32 %v1283_v39, %v2956_v28  ;;  %v1330_v28 = vrot.slane %v2946_v18, 1 }
 0x183   : > { %v3081_v38 = vpop.f32.mrf.mxu0  ;;  %v3083_v0 = vpop.f32.mrf.mxu1 }
 0x184   : > { %3565 = vst [vmem:[#allocation63_spill] sm:$0xff] %v3083_v0  ;;  %v3476_v45 = vrot.slane %v3083_v0, 6 }
 0x186   : > { %2146 = vmatmul.msk.f32.gmra.mxu0 %vm114_vm2, %v2689_v42  ;;  %v1284_v42 = vrot.slane %v2999_v44, 4 }
 0x188   : > { %v1285_v27 = vsel %vm842_vm6, %v1283_v39, %v1284_v42  ;;  %v1347_v39 = vrot.slane %v3011_v52, 4 }
 0x18b   : > { %v514_v40 = vpop.f32.mrf.mxu0  ;;  %v575_v36 = vpop.f32.mrf.mxu1 }
 0x18c   : > { %v1292_v14 = vrot.slane %v514_v40, 5  ;;  %v1054_v10 = vrot.slane %v575_v36, 6  ;;  %v1331_v36 = vrot.slane %v2966_v53, 1  ;;  %v1107_v40 = vsel %vm169_vm0, %v1045_v55, %v1106_v35 }
 0x18d   : > { %v1110_v18 = vadd.f32 %v1107_v40, %v2923_v6  ;;  %v1289_v53 = vadd.f32 %v1285_v27, %v2949_v54  ;;  %v1168_v54 = vrot.slane %v3069_v61, 5  ;;  %v1348_v27 = vsel %vm842_vm6, %v1284_v42, %v1347_v39 }
 0x18e   : > { %v3096_v15 = vadd.f32 %v1292_v14, %v1288_v41  ;;  %2147 = vmatmul.msk.f32.gmra.mxu0 %vm114_vm2, %v2706_v51  ;;  %v1055_v32 = vsel %vm313_vm1, %v3476_v45, %v1054_v10  ;;  %v1340_v51 = vrot.slane %v2981_v9, 2  ;;  %v1111_v41 = vadd.f32 %v1106_v35, %v2917_v2 }
 0x18f   : > { %v3103_v58 = vadd.f32 %v1055_v32, %v1050_v60  ;;  %v1332_v32 = vsel %vm822_vm4, %v1330_v28, %v1331_v36  ;;  %v1336_v9 = vadd.f32 %v1331_v36, %v2944_v25 }
 0x190   : > { %v1341_v6 = vsel %vm832_vm5, %v1339_v34, %v1340_v51  ;;  %v1335_v52 = vadd.f32 %v1332_v32, %v2930_v17  ;;  %v1169_v34 = vrot.slane %v3075_v3, 5 }
 0x191   : > { %v1345_v28 = vadd.f32 %v1340_v51, %v1336_v9 }
 0x192   : > { %v1170_v3 = vsel %vm169_vm0, %v1168_v54, %v1169_v34 }
 0x193   : > { %v517_v44 = vpop.f32.mrf.mxu0  ;;  %v578_v50 = vpop.f32.mrf.mxu1 }
 0x194   : > { %v1293_v0 = vrot.slane %v517_v44, 5  ;;  %v1113_v45 = vrot.slane %v578_v50, 6  ;;  %v1352_v44 = vadd.f32 %v1347_v39, %v1345_v28  ;;  %v1173_v50 = vadd.f32 %v1168_v54, %v2933_v20 }
 0x196   : > { %v1294_v55 = vsel %vm169_vm0, %v1292_v14, %v1293_v0  ;;  %v3117_v60 = vadd.f32 %v1113_v45, %v1111_v41  ;;  %2148 = vmatmul.msk.f32.gmra.mxu0 %vm114_vm2, %v2726_v12  ;;  %v1114_v21 = vsel %vm313_vm1, %v1054_v10, %v1113_v45  ;;  %v1392_v14 = vrot.slane %v2985_v49, 1 }
 0x197   : > { %v3122_v35 = vadd.f32 %v1114_v21, %v1110_v18  ;;  %v3124_v2 = vadd.f32 %v1294_v55, %v1289_v53  ;;  %v1344_v12 = vadd.f32 %v1341_v6, %v1335_v52  ;;  %v1399_v10 = vrot.slane %v2997_v29, 2 }
 0x198   : > { %v1393_v61 = vsel %vm822_vm4, %v1331_v36, %v1392_v14  ;;  %v1407_v36 = vrot.slane %v3023_v16, 4  ;;  %v861_v29 = vrot.slane %v3049_v30, 6 }
 0x199   : > { %v1351_v17 = vadd.f32 %v1348_v27, %v1344_v12  ;;  %v1400_v20 = vsel %vm832_vm5, %v1340_v51, %v1399_v10  ;;  %v1396_v55 = vadd.f32 %v1393_v61, %v2944_v25  ;;  %v1174_v27 = vadd.f32 %v1170_v3, %v2958_v22 }
 0x19b   : > { %v520_v45 = vpop.f32.mrf.mxu0  ;;  %v581_v40 = vpop.f32.mrf.mxu1  ;;  %v1403_v21 = vadd.f32 %v1400_v20, %v1396_v55 }
 0x19c   : > { %v1354_v41 = vrot.slane %v520_v45, 5  ;;  %v1177_v18 = vrot.slane %v581_v40, 6 }
 0x19d   : > { %v1412_v6 = vadd.f32 %v1407_v36, %v1403_v21 }
 0x19e   : > { %v1355_v32 = vsel %vm169_vm0, %v1293_v0, %v1354_v41  ;;  %v1359_v42 = vadd.f32 %v1354_v41, %v1352_v44  ;;  %v3139_v53 = vadd.f32 %v1177_v18, %v1173_v50  ;;  %2149 = vmatmul.msk.f32.gmra.mxu0 %vm114_vm2, %v2742_v11  ;;  %v1230_v11 = vrot.slane %v3081_v38, 5  ;;  %v3159_v41 = vpop.f32.mrf.mxu3 }
 0x19f   : > { %v1358_v39 = vadd.f32 %v1355_v32, %v1351_v17  ;;  %v3169_v17 = vpop.f32.mrf.mxu2 }
 0x1a0   : > { %v1231_v16 = vsel %vm169_vm0, %v1169_v34, %v1230_v11  ;;  %v1235_v40 = vadd.f32 %v1230_v11, %v2969_v5 }
 0x1a1   : > { %v1234_v22 = vadd.f32 %v1231_v16, %v2975_v13 }
 0x1a3   : > { %v523_v9 = vpop.f32.mrf.mxu0  ;;  %v584_v0 = vpop.f32.mrf.mxu1 }
 0x1a4   : > { %v1416_v52 = vrot.slane %v523_v9, 5  ;;  %v1178_v28 = vrot.slane %v584_v0, 6 }
 0x1a6   : > { %v1421_v12 = vadd.f32 %v1416_v52, %v1412_v6  ;;  %2150 = vmatmul.msk.f32.gmra.mxu0 %vm114_vm2, %v2753_v43  ;;  %v1179_v25 = vsel %vm313_vm1, %v1177_v18, %v1178_v28  ;;  %v707_v20 = vpop.f32.mrf.mxu3 }
 0x1a7   : > { %v3154_v51 = vadd.f32 %v1179_v25, %v1174_v27  ;;  %v3176_v3 = vpop.f32.mrf.mxu2 }
 0x1ab   : > { %v526_v54 = vpop.f32.mrf.mxu0  ;;  %v587_v45 = vpop.f32.mrf.mxu1 }
 0x1ac   : > { %v1417_v44 = vrot.slane %v526_v54, 5  ;;  %v1237_v50 = vrot.slane %v587_v45, 6 }
 0x1ae   : > { %v1418_v38 = vsel %vm169_vm0, %v1416_v52, %v1417_v44  ;;  %v3162_v61 = vadd.f32 %v1237_v50, %v1235_v40  ;;  %2151 = vmatmul.msk.f32.gmra.mxu0 %vm114_vm2, %v2579_v63  ;;  %v1238_v43 = vsel %vm313_vm1, %v1178_v28, %v1237_v50  ;;  %v3184_v6 = vpop.f32.mrf.mxu3 }
 0x1af   : > { %v3167_v18 = vadd.f32 %v1238_v43, %v1234_v22 }
 0x1b3   : > { %v529_v5 = vpop.f32.mrf.mxu0  ;;  %v590_v34 = vpop.f32.mrf.mxu1 }
 0x1b4   : > { %v1301_v32 = vrot.slane %v590_v34, 6  ;;  %v853_v34 = vrot.slane %v3001_v26, 5 }
 0x1b6   : > { %v3172_v13 = vadd.f32 %v1301_v32, %v3096_v15  ;;  %2152 = vmatmul.msk.f32.gmra.mxu0 %vm114_vm2, %v2582_v56  ;;  %v639_v56 = vpop.f32.mrf.mxu2  ;;  %v3194_v45 = vpop.f32.mrf.mxu3  ;;  %v858_v30 = vadd.f32 %v853_v34, %v2839_v47 }
 0x1bb   : > { %v593_v55 = vpop.f32.mrf.mxu1  ;;  %v769_v21 = vpop.f32.mrf.mxu0 }
 0x1bc   : > { %v1302_v63 = vrot.slane %v593_v55, 6 }
 0x1be   : > { %2153 = vmatmul.msk.f32.gmra.mxu0 %vm114_vm2, %v2589_v57  ;;  %v1303_v9 = vsel %vm313_vm1, %v1301_v32, %v1302_v63  ;;  %v921_v32 = vrot.slane %v3025_v37, 5  ;;  %v3209_v49 = vpop.f32.mrf.mxu3  ;;  %v3568_v37 = vld [vmem:[#allocation59_spill] sm:$0xff] }
 0x1bf   : > { %v3182_v0 = vadd.f32 %v1303_v9, %v3124_v2  ;;  %v1408_v2 = vrot.slane %v3035_v46, 4 }
 0x1c1   : > { %v1409_v44 = vsel %vm842_vm6, %v1407_v36, %v1408_v2  ;;  %v920_v36 = vrot.slane %v3013_v24, 5  ;;  %v872_v24 = vrot.slane %v3159_v41, 1 }
 0x1c3   : > { %v596_v15 = vpop.f32.mrf.mxu1  ;;  %v771_v52 = vpop.f32.mrf.mxu0  ;;  %v922_v21 = vsel %vm169_vm0, %v920_v36, %v921_v32 }
 0x1c4   : > { %v1361_v28 = vrot.slane %v596_v15, 6  ;;  %v873_v15 = vrot.slane %v707_v20, 1 }
 0x1c6   : > { %v3186_v27 = vadd.f32 %v1361_v28, %v1359_v42  ;;  %2154 = vmatmul.msk.f32.gmra.mxu0 %vm114_vm2, %v2601_v59  ;;  %v1362_v11 = vsel %vm313_vm1, %v1302_v63, %v1361_v28  ;;  %v1397_v42 = vadd.f32 %v1392_v14, %v2779_v1  ;;  %v3202_v59 = vpop.f32.mrf.mxu2  ;;  %v852_v14 = vrot.slane %v2987_v48, 5 }
 0x1c7   : > { %v3191_v25 = vadd.f32 %v1362_v11, %v1358_v39  ;;  %v929_v63 = vrot.slane %v3065_v31, 6  ;;  %v939_v31 = vrot.slane %v3184_v6, 1  ;;  %v874_v41 = vsel %vm822_vm4, %v872_v24, %v873_v15 }
 0x1c8   : > { %v1404_v39 = vadd.f32 %v1399_v10, %v1397_v42  ;;  %v862_v10 = vrot.slane %v3059_v33, 6  ;;  %v854_v26 = vsel %vm169_vm0, %v852_v14, %v853_v34  ;;  %v3244_v14 = vperm.slane %v2289_v4, 0 }
 0x1c9   : > { %v857_v52 = vadd.f32 %v854_v26, %v2841_v8 }
 0x1ca   : > { %v1413_v43 = vadd.f32 %v1409_v44, %v1404_v39  ;;  %v863_v33 = vsel %vm313_vm1, %v861_v29, %v862_v10  ;;  %v867_v11 = vadd.f32 %v862_v10, %v858_v30  ;;  %v3238_v44 = vpop.f32.mrf.mxu3 }
 0x1cb   : > { %v599_v57 = vpop.f32.mrf.mxu1  ;;  %v773_v16 = vpop.f32.mrf.mxu0  ;;  %v866_v2 = vadd.f32 %v863_v33, %v857_v52 }
 0x1cc   : > { %v1425_v54 = vrot.slane %v599_v57, 6  ;;  %v1422_v5 = vadd.f32 %v1418_v38, %v1413_v43  ;;  %v930_v38 = vrot.slane %v3071_v7, 6  ;;  %v926_v57 = vadd.f32 %v922_v21, %v2868_v23 }
 0x1cd   : > { %v925_v16 = vadd.f32 %v920_v36, %v2855_v19  ;;  %v868_v8 = vadd.f32 %v866_v2, %v3169_v17  ;;  %v940_v23 = vsel %vm822_vm4, %v873_v15, %v939_v31 }
 0x1ce   : > { %v3196_v40 = vadd.f32 %v1425_v54, %v1421_v12  ;;  %v3219_v55 = vpop.f32.mrf.mxu2  ;;  %v931_v28 = vsel %vm313_vm1, %v929_v63, %v930_v38 }
 0x1cf   : > { %v935_v42 = vadd.f32 %v931_v28, %v926_v57  ;;  %v934_v20 = vadd.f32 %v929_v63, %v925_v16  ;;  %v877_v19 = vadd.f32 %v874_v41, %v868_v8 }
 0x1d1   : > { %v936_v6 = vadd.f32 %v934_v20, %v3176_v3 }
 0x1d2   : > { %v3251_v30 = vpop.f32.mrf.mxu3 }
 0x1d3   : > { %v602_v50 = vpop.f32.mrf.mxu1  ;;  %v775_v22 = vpop.f32.mrf.mxu0  ;;  %v943_v17 = vadd.f32 %v940_v23, %v936_v6 }
 0x1d4   : > { %v1426_v46 = vrot.slane %v602_v50, 6  ;;  %v881_v39 = vrot.slane %v775_v22, 2  ;;  %v937_v50 = vadd.f32 %v935_v42, %v639_v56  ;;  %v3566_v42 = vld [vmem:[#allocation62_spill] sm:$0xff] }
 0x1d5   : > { %v989_v41 = vrot.slane %v3566_v42, 6 }
 0x1d6   : > { %v1427_v12 = vsel %vm313_vm1, %v1425_v54, %v1426_v46  ;;  %v869_v54 = vadd.f32 %v867_v11, %v3176_v3  ;;  %v944_v34 = vadd.f32 %v939_v31, %v937_v50  ;;  %v648_v10 = vpop.f32.mrf.mxu2  ;;  %v982_v31 = vrot.slane %v3037_v62, 5 }
 0x1d7   : > { %v3211_v1 = vadd.f32 %v1427_v12, %v1422_v5  ;;  %v990_v62 = vsel %vm313_vm1, %v930_v38, %v989_v41 }
 0x1d8   : > { %v878_v43 = vadd.f32 %v873_v15, %v869_v54 }
 0x1db   : > { %v778_v9 = vpop.f32.mrf.mxu0  ;;  %v605_v48 = vpop.f32.mrf.mxu1 }
 0x1dc   : > { %v882_v47 = vrot.slane %v778_v9, 2 }
 0x1de   : > { %v883_v46 = vsel %vm832_vm5, %v881_v39, %v882_v47  ;;  %v887_v12 = vadd.f32 %v882_v47, %v878_v43  ;;  %v3254_v16 = vpop.f32.mrf.mxu2  ;;  %v983_v39 = vsel %vm169_vm0, %v921_v32, %v982_v31  ;;  %v3567_v43 = vld [vmem:[#allocation58_spill] sm:$0xff] }
 0x1df   : > { %v886_v36 = vadd.f32 %v883_v46, %v877_v19  ;;  %v987_v23 = vadd.f32 %v982_v31, %v3567_v43  ;;  %v999_v19 = vrot.slane %v3194_v45, 1  ;;  %v1000_v46 = vrot.slane %v3209_v49, 1 }
 0x1e0   : > { %v892_v21 = vadd.f32 %v3244_v14, %v887_v12  ;;  %v1063_v12 = vrot.slane %v3238_v44, 1 }
 0x1e1   : > { %v891_v9 = vadd.f32 %v3244_v14, %v886_v36  ;;  %v994_v32 = vadd.f32 %v989_v41, %v987_v23  ;;  %v1001_v44 = vsel %vm822_vm4, %v999_v19, %v1000_v46 }
 0x1e2   : > { %v894_v15 = vmax.f32 %v892_v21, 0.0 }
 0x1e3   : > { %v781_v5 = vpop.f32.mrf.mxu0  ;;  %v893_v11 = vmax.f32 %v891_v9, 0.0  ;;  %v996_v49 = vadd.f32 %v994_v32, %v3219_v55  ;;  %v1061_v9 = vadd.f32 %v3103_v58, %v648_v10 }
 0x1e4   : > { %v946_v29 = vrot.slane %v781_v5, 2  ;;  %v725_v5 = vpop.f32.mrf.mxu3 }
 0x1e6   : > { %v947_v56 = vsel %vm832_vm5, %v882_v47, %v946_v29  ;;  %v951_v22 = vadd.f32 %v946_v29, %v944_v34  ;;  %v986_v34 = vadd.f32 %v983_v39, %v3568_v37  ;;  %v3569_v29 = vld [vmem:[#allocation60_spill] sm:$0xff]  ;;  %v654_v21 = vpop.f32.mrf.mxu2 }
 0x1e7   : > { %v950_v26 = vadd.f32 %v947_v56, %v943_v17  ;;  %v3570_v17 = vld [vmem:[#allocation61_spill] sm:$0xff]  ;;  %v3572_v56 = vld [vmem:[#allocation63_spill] sm:$0xff] }
 0x1e8   : > { %v953_v3 = vadd.f32 %v951_v22, %v3244_v14  ;;  %v3571_v36 = vrot.slane %v3570_v17, 5  ;;  %v993_v45 = vadd.f32 %v990_v62, %v986_v34  ;;  %v3573_v22 = vrot.slane %v3572_v56, 6 }
 0x1e9   : > { %v952_v63 = vadd.f32 %v950_v26, %v3244_v14 }
 0x1ea   : > { %v955_v48 = vmax.f32 %v953_v3, 0.0  ;;  %v1049_v7 = vadd.f32 %v3571_v36, %v3569_v29 }
 0x1eb   : > { %v954_v33 = vmax.f32 %v952_v63, 0.0  ;;  %v784_v24 = vpop.f32.mrf.mxu0  ;;  %v995_v63 = vadd.f32 %v993_v45, %v3202_v59  ;;  %v1124_v45 = vrot.slane %v725_v5, 1 }
 0x1ec   : > { %v1455_v52 = vrot.slane %v955_v48, 4  ;;  %v1058_v26 = vadd.f32 %v3573_v22, %v1049_v7  ;;  %v1008_v3 = vrot.slane %v784_v24, 2  ;;  %v1005_v48 = vadd.f32 %v1000_v46, %v996_v49  ;;  %v728_v59 = vpop.f32.mrf.mxu3 }
 0x1ed   : > { %v1454_v28 = vrot.slane %v954_v33, 4  ;;  %v1064_v33 = vsel %vm822_vm4, %v1000_v46, %v1063_v12  ;;  %v1187_v56 = vrot.slane %v728_v59, 1 }
 0x1ee   : > { %v1460_v57 = vmax.f32 %v894_v15, %v1455_v52  ;;  %v1060_v15 = vadd.f32 %v1058_v26, %v3219_v55  ;;  %v657_v39 = vpop.f32.mrf.mxu2  ;;  %v1120_v26 = vadd.f32 %v3117_v60, %v654_v21 }
 0x1ef   : > { %v1456_v2 = vsel %vm842_vm6, %v1454_v28, %v1455_v52  ;;  %v1185_v5 = vadd.f32 %v3154_v51, %v657_v39 }
 0x1f0   : > { %v1459_v47 = vmax.f32 %v893_v11, %v1456_v2  ;;  %v1474_v54 = vrot.slane %v1460_v57, 1  ;;  %v1004_v11 = vadd.f32 %v1001_v44, %v995_v63  ;;  %v1129_v63 = vadd.f32 %v1124_v45, %v1120_v26 }
 0x1f2   : > { %v1462_v20 = vrot.slane %v1459_v47, 1  ;;  %v1476_v8 = vmax.f32 %v1460_v57, %v1474_v54  ;;  %v1068_v57 = vadd.f32 %v1063_v12, %v1061_v9  ;;  %v1188_v9 = vsel %vm822_vm4, %v1124_v45, %v1187_v56 }
 0x1f3   : > { %v787_v50 = vpop.f32.mrf.mxu0 }
 0x1f4   : > { %v1464_v6 = vmax.f32 %v1459_v47, %v1462_v20  ;;  %1477 = vst.msk [vmem:[#allocation2 + $0x4] sm:$0x1] %vm1465_vm7, %v1476_v8  ;;  %v1009_v38 = vrot.slane %v787_v50, 2  ;;  %v1067_v47 = vadd.f32 %v1064_v33, %v1060_v15  ;;  %v3292_v12 = vpop.f32.mrf.mxu3 }
 0x1f6   : > { %1466 = vst.msk [vmem:[#allocation2] sm:$0x1] %vm1465_vm7, %v1464_v6  ;;  %v1010_v52 = vsel %vm832_vm5, %v1008_v3, %v1009_v38  ;;  %v1014_v31 = vadd.f32 %v1009_v38, %v1005_v48  ;;  %v3296_v49 = vpop.f32.mrf.mxu2  ;;  %v1184_v48 = vadd.f32 %v3139_v53, %v654_v21 }
 0x1f7   : > { %1468 = vst.msk [vmem:[#allocation2 - $0x1] sm:$0x4] %vm1467_vm8, %v1464_v6  ;;  %v1013_v54 = vadd.f32 %v1010_v52, %v1004_v11 }
 0x1f8   : > { %1470 = vst.msk [vmem:[#allocation2 - $0x2] sm:$0x10] %vm1469_vm9, %v1464_v6  ;;  %v1016_v58 = vadd.f32 %v1014_v31, %v3244_v14  ;;  %v1191_v31 = vadd.f32 %v1188_v9, %v1184_v48 }
 0x1f9   : > { %1472 = vst.msk [vmem:[#allocation2 - $0x3] sm:$0x40] %vm1471_vm10, %v1464_v6  ;;  %v1015_v20 = vadd.f32 %v1013_v54, %v3244_v14 }
 0x1fa   : > { %v1018_v23 = vmax.f32 %v1016_v58, 0.0  ;;  %v3575_v58 = vld [vmem:[#allocation42_spill] sm:$0xff] }
 0x1fb   : > { %v790_v28 = vpop.f32.mrf.mxu0  ;;  %v1017_v19 = vmax.f32 %v1015_v20, 0.0 }
 0x1fc   : > { %v1070_v2 = vrot.slane %v790_v28, 2  ;;  %v734_v33 = vpop.f32.mrf.mxu3  ;;  %v1192_v28 = vadd.f32 %v1187_v56, %v1185_v5 }
 0x1fd   : > { %v1248_v5 = vrot.slane %v734_v33, 1 }
 0x1fe   : > { %v1071_v24 = vsel %vm832_vm5, %v1009_v38, %v1070_v2  ;;  %v1075_v42 = vadd.f32 %v1070_v2, %v1068_v57  ;;  %v1123_v38 = vrot.slane %v3251_v30, 1  ;;  %v1119_v30 = vadd.f32 %v3122_v35, %v3254_v16  ;;  %v663_v51 = vpop.f32.mrf.mxu2 }
 0x1ff   : > { %v1074_v41 = vadd.f32 %v1071_v24, %v1067_v47 }
 0x200   : > { %v1077_v10 = vadd.f32 %v1075_v42, %v3244_v14  ;;  %v1125_v44 = vsel %vm822_vm4, %v1123_v38, %v1124_v45  ;;  %v3574_v42 = vld [vmem:[#allocation38_spill] sm:$0xff]  ;;  %v3584_v38 = vld [vmem:[#allocation39_spill] sm:$0xff] }
 0x201   : > { %v1076_v55 = vadd.f32 %v1074_v41, %v3244_v14  ;;  %v1128_v52 = vadd.f32 %v1125_v44, %v1119_v30  ;;  %v3585_v45 = vld [vmem:[#allocation31_spill] sm:$0xff]  ;;  %v1247_v30 = vrot.slane %v3292_v12, 1  ;;  %v1243_v12 = vadd.f32 %v3167_v18, %v3296_v49 }
 0x202   : > { %v1079_v8 = vmax.f32 %v1077_v10, 0.0  ;;  %v3576_v10 = vld [vmem:[#allocation34_spill] sm:$0xff] }
 0x203   : > { %v1078_v50 = vmax.f32 %v1076_v55, 0.0  ;;  %v793_v43 = vpop.f32.mrf.mxu0 }
 0x204   : > { %v1481_v6 = vrot.slane %v1079_v8, 4  ;;  %v1132_v3 = vrot.slane %v793_v43, 2  ;;  %v3577_v8 = vld [vmem:[#allocation37_spill] sm:$0xff] }
 0x205   : > { %v1480_v62 = vrot.slane %v1078_v50, 4  ;;  %v3578_v43 = vld [vmem:[#allocation41_spill] sm:$0xff] }
 0x206   : > { %v1486_v46 = vmax.f32 %v1018_v23, %v1481_v6  ;;  %v3579_v23 = vld [vmem:[#allocation33_spill] sm:$0xff]  ;;  %v666_v56 = vpop.f32.mrf.mxu2 }
 0x207   : > { %v1482_v37 = vsel %vm842_vm6, %v1480_v62, %v1481_v6  ;;  %v737_v6 = vpop.f32.mrf.mxu3  ;;  %v1309_v33 = vadd.f32 %v3182_v0, %v666_v56 }
 0x208   : > { %v1485_v34 = vmax.f32 %v1017_v19, %v1482_v37  ;;  %v1496_v32 = vrot.slane %v1486_v46, 1  ;;  %v3580_v19 = vld [vmem:[#allocation36_spill] sm:$0xff] }
 0x20a   : > { %v1488_v29 = vrot.slane %v1485_v34, 1  ;;  %v1498_v17 = vmax.f32 %v1486_v46, %v1496_v32  ;;  %v3582_v32 = vld [vmem:[#allocation32_spill] sm:$0xff] }
 0x20b   : > { %v796_v36 = vpop.f32.mrf.mxu0 }
 0x20c   : > { %v1490_v7 = vmax.f32 %v1485_v34, %v1488_v29  ;;  %1499 = vst.msk [vmem:[#allocation2 + $0x9] sm:$0x1] %vm1465_vm7, %v1498_v17  ;;  %v1133_v22 = vrot.slane %v796_v36, 2  ;;  %v3581_v34 = vld [vmem:[#allocation40_spill] sm:$0xff]  ;;  %v3583_v17 = vld [vmem:[#allocation35_spill] sm:$0xff] }
 0x20e   : > { %1491 = vst.msk [vmem:[#allocation2 + $0x5] sm:$0x1] %vm1465_vm7, %v1490_v7  ;;  %v1134_v60 = vsel %vm832_vm5, %v1132_v3, %v1133_v22  ;;  %v1138_v11 = vadd.f32 %v1133_v22, %v1129_v63  ;;  %v1311_v63 = vrot.slane %v737_v6, 1 }
 0x20f   : > { %1492 = vst.msk [vmem:[#allocation2 + $0x4] sm:$0x4] %vm1467_vm8, %v1490_v7  ;;  %v1137_v2 = vadd.f32 %v1134_v60, %v1128_v52  ;;  %v740_v9 = vpop.f32.mrf.mxu3  ;;  %v1244_v60 = vadd.f32 %v3162_v61, %v663_v51 }
 0x210   : > { %1493 = vst.msk [vmem:[#allocation2 + $0x3] sm:$0x10] %vm1469_vm9, %v1490_v7  ;;  %v1140_v53 = vadd.f32 %v1138_v11, %v3244_v14  ;;  %v1312_v11 = vsel %vm822_vm4, %v1248_v5, %v1311_v63 }
 0x211   : > { %1494 = vst.msk [vmem:[#allocation2 + $0x2] sm:$0x40] %vm1471_vm10, %v1490_v7  ;;  %v1139_v59 = vadd.f32 %v1137_v2, %v3244_v14 }
 0x212   : > { %v1142_v39 = vmax.f32 %v1140_v53, 0.0 }
 0x213   : > { %v799_v15 = vpop.f32.mrf.mxu0  ;;  %v1141_v46 = vmax.f32 %v1139_v59, 0.0 }
 0x214   : > { %v1194_v57 = vrot.slane %v799_v15, 2  ;;  %v1249_v15 = vsel %vm822_vm4, %v1247_v30, %v1248_v5 }
 0x216   : > { %v1195_v35 = vsel %vm832_vm5, %v1133_v22, %v1194_v57  ;;  %v1199_v16 = vadd.f32 %v1194_v57, %v1192_v28  ;;  %v1253_v28 = vadd.f32 %v1248_v5, %v1244_v60  ;;  %v1308_v57 = vadd.f32 %v3172_v13, %v663_v51 }
 0x217   : > { %v1198_v47 = vadd.f32 %v1195_v35, %v1191_v31  ;;  %v3311_v54 = vld [vmem:[#allocation2] sm:$0xff]  ;;  %v669_v31 = vpop.f32.mrf.mxu2  ;;  %v1252_v35 = vadd.f32 %v1249_v15, %v1243_v12 }
 0x218   : > { %v1201_v21 = vadd.f32 %v1199_v16, %v3244_v14  ;;  %2155 = vmatmul.msk.f32.vlgmr.msrb.gmra.mxu1 %vm1570_vm11, %v3311_v54  ;;  %2159 = vmatmul.msk.f32.vlgmr.msrb.gmra.mxu2 %vm1570_vm11, %v3311_v54  ;;  %v1316_v16 = vadd.f32 %v1311_v63, %v1309_v33 }
 0x219   : > { %v1200_v24 = vadd.f32 %v1198_v47, %v3244_v14  ;;  %2163 = vmatmul.msk.f32.vlgmr.msrb.gmra.mxu3 %vm1570_vm11, %v3311_v54  ;;  %1783 = vmatpush.msrb.mxu2 %v3574_v42 }
 0x21a   : > { %v1203_v41 = vmax.f32 %v1201_v21, 0.0  ;;  %1810 = vmatpush.msrb.mxu3 %v3575_v58  ;;  %1756 = vmatpush.msrb.mxu1 %v3576_v10  ;;  %v1315_v21 = vadd.f32 %v1312_v11, %v1308_v57 }
 0x21b   : > { %v1202_v55 = vmax.f32 %v1200_v24, 0.0  ;;  %v802_v20 = vpop.f32.mrf.mxu0  ;;  %1784 = vmatpush.msrb.mxu2 %v3577_v8 }
 0x21c   : > { %v1503_v50 = vrot.slane %v1203_v41, 4  ;;  %1811 = vmatpush.msrb.mxu3 %v3578_v43  ;;  %1757 = vmatpush.msrb.mxu1 %v3579_v23  ;;  %v1256_v52 = vrot.slane %v802_v20, 2  ;;  %v743_v41 = vpop.f32.mrf.mxu3 }
 0x21d   : > { %v1502_v62 = vrot.slane %v1202_v55, 4  ;;  %1785 = vmatpush.msrb.mxu2 %v3580_v19 }
 0x21e   : > { %v1508_v37 = vmax.f32 %v1142_v39, %v1503_v50  ;;  %1812 = vmatpush.msrb.mxu3 %v3581_v34  ;;  %1758 = vmatpush.msrb.mxu1 %v3582_v32 }
 0x21f   : > { %v1504_v29 = vsel %vm842_vm6, %v1502_v62, %v1503_v50  ;;  %1786 = vmatpush.msrb.mxu2 %v3583_v17  ;;  %v672_v39 = vpop.f32.mrf.mxu2  ;;  %v1371_v17 = vrot.slane %v740_v9, 1 }
 0x220   : > { %v1507_v36 = vmax.f32 %v1141_v46, %v1504_v29  ;;  %v1518_v7 = vrot.slane %v1508_v37, 1  ;;  %1813 = vmatpush.msrb.mxu3 %v3584_v38  ;;  %1759 = vmatpush.msrb.mxu1 %v3585_v45  ;;  %v1368_v56 = vadd.f32 %v3186_v27, %v672_v39  ;;  %v1432_v63 = vadd.f32 %v3196_v40, %v672_v39  ;;  %v3592_v39 = vld [vmem:[#allocation48_spill] sm:$0xff] }
 0x222   : > { %v1510_v22 = vrot.slane %v1507_v36, 1  ;;  %v1520_v26 = vmax.f32 %v1508_v37, %v1518_v7 }
 0x223   : > { %v805_v44 = vpop.f32.mrf.mxu0 }
 0x224   : > { %v1512_v3 = vmax.f32 %v1507_v36, %v1510_v22  ;;  %1521 = vst.msk [vmem:[#allocation2 + $0xe] sm:$0x1] %vm1465_vm7, %v1520_v26  ;;  %v1257_v48 = vrot.slane %v805_v44, 2  ;;  %v746_v34 = vpop.f32.mrf.mxu3  ;;  %v1372_v36 = vrot.slane %v743_v41, 1  ;;  %v1367_v44 = vadd.f32 %v3191_v25, %v669_v31 }
 0x225   : > { %v1435_v7 = vrot.slane %v746_v34, 1 }
 0x226   : > { %1513 = vst.msk [vmem:[#allocation2 + $0xa] sm:$0x1] %vm1465_vm7, %v1512_v3  ;;  %v1258_v61 = vsel %vm832_vm5, %v1256_v52, %v1257_v48  ;;  %v1262_v47 = vadd.f32 %v1257_v48, %v1253_v28  ;;  %v1373_v22 = vsel %vm822_vm4, %v1371_v17, %v1372_v36  ;;  %v1377_v30 = vadd.f32 %v1372_v36, %v1368_v56 }
 0x227   : > { %1514 = vst.msk [vmem:[#allocation2 + $0x9] sm:$0x4] %vm1467_vm8, %v1512_v3  ;;  %v1261_v24 = vadd.f32 %v1258_v61, %v1252_v35  ;;  %v675_v38 = vpop.f32.mrf.mxu2  ;;  %v1436_v5 = vsel %vm822_vm4, %v1372_v36, %v1435_v7  ;;  %v1376_v27 = vadd.f32 %v1373_v22, %v1367_v44 }
 0x228   : > { %1515 = vst.msk [vmem:[#allocation2 + $0x8] sm:$0x10] %vm1469_vm9, %v1512_v3  ;;  %v1264_v0 = vadd.f32 %v1262_v47, %v3244_v14  ;;  %v1439_v12 = vadd.f32 %v1436_v5, %v1432_v63 }
 0x229   : > { %1516 = vst.msk [vmem:[#allocation2 + $0x7] sm:$0x40] %vm1471_vm10, %v1512_v3  ;;  %v1263_v51 = vadd.f32 %v1261_v24, %v3244_v14  ;;  %v1433_v3 = vadd.f32 %v3211_v1, %v675_v38 }
 0x22a   : > { %v1266_v20 = vmax.f32 %v1264_v0, 0.0 }
 0x22b   : > { %v808_v2 = vpop.f32.mrf.mxu0  ;;  %v1265_v43 = vmax.f32 %v1263_v51, 0.0  ;;  %v1440_v60 = vadd.f32 %v1435_v7, %v1433_v3  ;;  %v3586_v51 = vld [vmem:[#allocation51_spill] sm:$0xff] }
 0x22c   : > { %v1318_v53 = vrot.slane %v808_v2, 2 }
 0x22e   : > { %v1319_v42 = vsel %vm832_vm5, %v1257_v48, %v1318_v53  ;;  %v1323_v18 = vadd.f32 %v1318_v53, %v1316_v16 }
 0x22f   : > { %v1322_v49 = vadd.f32 %v1319_v42, %v1315_v21 }
 0x230   : > { %v1325_v59 = vadd.f32 %v1323_v18, %v3244_v14 }
 0x231   : > { %v1324_v13 = vadd.f32 %v1322_v49, %v3244_v14 }
 0x232   : > { %v1327_v58 = vmax.f32 %v1325_v59, 0.0 }
 0x233   : > { %v1326_v10 = vmax.f32 %v1324_v13, 0.0  ;;  %v811_v55 = vpop.f32.mrf.mxu0 }
 0x234   : > { %v1525_v8 = vrot.slane %v1327_v58, 4  ;;  %v1380_v26 = vrot.slane %v811_v55, 2  ;;  %v3587_v58 = vld [vmem:[#allocation56_spill] sm:$0xff]  ;;  %v3589_v55 = vld [vmem:[#allocation55_spill] sm:$0xff] }
 0x235   : > { %v1524_v50 = vrot.slane %v1326_v10, 4  ;;  %v3588_v10 = vld [vmem:[#allocation50_spill] sm:$0xff] }
 0x236   : > { %v1530_v23 = vmax.f32 %v1266_v20, %v1525_v8  ;;  %v3590_v20 = vld [vmem:[#allocation49_spill] sm:$0xff] }
 0x237   : > { %v1526_v6 = vsel %vm842_vm6, %v1524_v50, %v1525_v8  ;;  %v3591_v8 = vld [vmem:[#allocation54_spill] sm:$0xff]  ;;  %v3593_v50 = vld [vmem:[#allocation47_spill] sm:$0xff] }
 0x238   : > { %v1529_v62 = vmax.f32 %v1265_v43, %v1526_v6  ;;  %v1540_v19 = vrot.slane %v1530_v23, 1  ;;  %v3594_v43 = vld [vmem:[#allocation53_spill] sm:$0xff] }
 0x239   : > { %v3596_v6 = vld [vmem:[#allocation45_spill] sm:$0xff] }
 0x23a   : > { %v1532_v46 = vrot.slane %v1529_v62, 1  ;;  %v1542_v37 = vmax.f32 %v1530_v23, %v1540_v19  ;;  %v3595_v23 = vld [vmem:[#allocation46_spill] sm:$0xff] }
 0x23b   : > { %v814_v32 = vpop.f32.mrf.mxu0 }
 0x23c   : > { %v1534_v29 = vmax.f32 %v1529_v62, %v1532_v46  ;;  %1543 = vst.msk [vmem:[#allocation2 + $0x13] sm:$0x1] %vm1465_vm7, %v1542_v37  ;;  %v1381_v45 = vrot.slane %v814_v32, 2  ;;  %v3597_v62 = vld [vmem:[#allocation44_spill] sm:$0xff] }
 0x23e   : > { %1535 = vst.msk [vmem:[#allocation2 + $0xf] sm:$0x1] %vm1465_vm7, %v1534_v29  ;;  %v1382_v9 = vsel %vm832_vm5, %v1380_v26, %v1381_v45  ;;  %v1386_v15 = vadd.f32 %v1381_v45, %v1377_v30 }
 0x23f   : > { %1536 = vst.msk [vmem:[#allocation2 + $0xe] sm:$0x4] %vm1467_vm8, %v1534_v29  ;;  %v1385_v28 = vadd.f32 %v1382_v9, %v1376_v27 }
 0x240   : > { %1537 = vst.msk [vmem:[#allocation2 + $0xd] sm:$0x10] %vm1469_vm9, %v1534_v29  ;;  %v1388_v1 = vadd.f32 %v1386_v15, %v3244_v14 }
 0x241   : > { %1538 = vst.msk [vmem:[#allocation2 + $0xc] sm:$0x40] %vm1471_vm10, %v1534_v29  ;;  %v1387_v61 = vadd.f32 %v1385_v28, %v3244_v14 }
 0x242   : > { %v1390_v16 = vmax.f32 %v1388_v1, 0.0 }
 0x243   : > { %v817_v48 = vpop.f32.mrf.mxu0  ;;  %v1389_v21 = vmax.f32 %v1387_v61, 0.0 }
 0x244   : > { %v1442_v52 = vrot.slane %v817_v48, 2 }
 0x245   : > { %v3368_v33 = vld [vmem:[#allocation2 + $0x8] sm:$0xff] }
 0x246   : > { %v1443_v25 = vsel %vm832_vm5, %v1381_v45, %v1442_v52  ;;  %v1447_v11 = vadd.f32 %v1442_v52, %v1440_v60  ;;  %2156 = vmatmul.msk.f32.gmra.mxu1 %vm1570_vm11, %v3368_v33  ;;  %2160 = vmatmul.msk.f32.gmra.mxu2 %vm1570_vm11, %v3368_v33 }
 0x247   : > { %v1446_v40 = vadd.f32 %v1443_v25, %v1439_v12  ;;  %2164 = vmatmul.msk.f32.gmra.mxu3 %vm1570_vm11, %v3368_v33 }
 0x248   : > { %v1449_v57 = vadd.f32 %v1447_v11, %v3244_v14 }
 0x249   : > { %v1448_v31 = vadd.f32 %v1446_v40, %v3244_v14 }
 0x24a   : > { %v1451_v2 = vmax.f32 %v1449_v57, 0.0 }
 0x24b   : > { %v1450_v35 = vmax.f32 %v1448_v31, 0.0 }
 0x24c   : > { %v1547_v47 = vrot.slane %v1451_v2, 4 }
 0x24d   : > { %v1546_v53 = vrot.slane %v1450_v35, 4 }
 0x24e   : > { %v1552_v24 = vmax.f32 %v1390_v16, %v1547_v47 }
 0x24f   : > { %v1548_v42 = vsel %vm842_vm6, %v1546_v53, %v1547_v47 }
 0x250   : > { %v1551_v18 = vmax.f32 %v1389_v21, %v1548_v42  ;;  %v1562_v49 = vrot.slane %v1552_v24, 1 }
 0x252   : > { %v1554_v0 = vrot.slane %v1551_v18, 1  ;;  %v1564_v59 = vmax.f32 %v1552_v24, %v1562_v49 }
 0x254   : > { %v1556_v41 = vmax.f32 %v1551_v18, %v1554_v0  ;;  %1565 = vst.msk [vmem:[#allocation2 + $0x18] sm:$0x1] %vm1465_vm7, %v1564_v59 }
 0x256   : > { %1557 = vst.msk [vmem:[#allocation2 + $0x14] sm:$0x1] %vm1465_vm7, %v1556_v41 }
 0x257   : > { %1558 = vst.msk [vmem:[#allocation2 + $0x13] sm:$0x4] %vm1467_vm8, %v1556_v41 }
 0x258   : > { %1559 = vst.msk [vmem:[#allocation2 + $0x12] sm:$0x10] %vm1469_vm9, %v1556_v41 }
 0x259   : > { %1560 = vst.msk [vmem:[#allocation2 + $0x11] sm:$0x40] %vm1471_vm10, %v1556_v41 }
 0x25b   : > { %v1569_v13 = vld [vmem:[#allocation2 + $0x18] sm:$0x1] }
 0x260   : > { %v1568_v14 = vld [vmem:[#allocation2 + $0x10] sm:$0xff] }
 0x261   : > { %2157 = vmatmul.msk.f32.gmra.mxu1 %vm1570_vm11, %v1568_v14  ;;  %2161 = vmatmul.msk.f32.gmra.mxu2 %vm1570_vm11, %v1568_v14 }
 0x262   : > { %2165 = vmatmul.msk.f32.gmra.mxu3 %vm1570_vm11, %v1568_v14 }
 0x269   : > { %2158 = vmatmul.msk.f32.gmra.mxu1 %vm1570_vm11, %v1569_v13  ;;  %2162 = vmatmul.msk.f32.gmra.mxu2 %vm1570_vm11, %v1569_v13 }
 0x26a   : > { %2166 = vmatmul.msk.f32.gmra.mxu3 %vm1570_vm11, %v1569_v13 }
 0x271   : > { %2167 = vmatmul.msk.f32.vlgmr.msra.gmra.mxu1 %vm1570_vm11, %v3311_v54  ;;  %2171 = vmatmul.msk.f32.vlgmr.msra.gmra.mxu2 %vm1570_vm11, %v3311_v54 }
 0x272   : > { %2175 = vmatmul.msk.f32.vlgmr.msra.gmra.mxu3 %vm1570_vm11, %v3311_v54  ;;  %1921 = vmatpush.msra.mxu1 %v3586_v51 }
 0x273   : > { %1949 = vmatpush.msra.mxu2 %v3587_v58 }
 0x274   : > { %1922 = vmatpush.msra.mxu1 %v3588_v10 }
 0x275   : > { %1950 = vmatpush.msra.mxu2 %v3589_v55 }
 0x276   : > { %1923 = vmatpush.msra.mxu1 %v3590_v20 }
 0x277   : > { %1951 = vmatpush.msra.mxu2 %v3591_v8 }
 0x278   : > { %1924 = vmatpush.msra.mxu1 %v3592_v39 }
 0x279   : > { %2168 = vmatmul.msk.f32.gmra.mxu1 %vm1570_vm11, %v3368_v33  ;;  %2172 = vmatmul.msk.f32.gmra.mxu2 %vm1570_vm11, %v3368_v33 }
 0x27a   : > { %2176 = vmatmul.msk.f32.gmra.mxu3 %vm1570_vm11, %v3368_v33  ;;  %1925 = vmatpush.msra.mxu1 %v3593_v50 }
 0x27b   : > { %1952 = vmatpush.msra.mxu2 %v3594_v43 }
 0x27c   : > { %1926 = vmatpush.msra.mxu1 %v3595_v23 }
 0x27e   : > { %1927 = vmatpush.msra.mxu1 %v3596_v6 }
 0x280   : > { %1928 = vmatpush.msra.mxu1 %v3597_v62 }
 0x281   : > { %2169 = vmatmul.msk.f32.gmra.mxu1 %vm1570_vm11, %v1568_v14  ;;  %2173 = vmatmul.msk.f32.gmra.mxu2 %vm1570_vm11, %v1568_v14 }
 0x282   : > { %2177 = vmatmul.msk.f32.gmra.mxu3 %vm1570_vm11, %v1568_v14 }
 0x289   : > { %2170 = vmatmul.msk.f32.gmra.mxu1 %vm1570_vm11, %v1569_v13  ;;  %2174 = vmatmul.msk.f32.gmra.mxu2 %vm1570_vm11, %v1569_v13 }
 0x28a   : > { %2178 = vmatmul.msk.f32.gmra.mxu3 %vm1570_vm11, %v1569_v13 }
 0x291   : > { %2179 = vmatmul.msk.f32.vlgmr.msrb.gmra.mxu1 %vm1570_vm11, %v3311_v54  ;;  %2183 = vmatmul.msk.f32.vlgmr.msrb.gmra.mxu2 %vm1570_vm11, %v3311_v54 }
 0x292   : > { %2187 = vmatmul.msk.f32.vlgmr.msrb.gmra.mxu3 %vm1570_vm11, %v3311_v54 }
 0x295   : > { %v1600_v34 = vpop.f32.mrf.mxu1 }
 0x299   : > { %2180 = vmatmul.msk.f32.gmra.mxu1 %vm1570_vm11, %v3368_v33  ;;  %2184 = vmatmul.msk.f32.gmra.mxu2 %vm1570_vm11, %v3368_v33 }
 0x29a   : > { %2188 = vmatmul.msk.f32.gmra.mxu3 %vm1570_vm11, %v3368_v33 }
 0x29b   : > { %v1626_v19 = vpop.f32.mrf.mxu2 }
 0x29c   : > { %v1826_v46 = vrot.slane %v1626_v19, 1  ;;  %v1653_v37 = vpop.f32.mrf.mxu3 }
 0x29d   : > { %v1830_v29 = vrot.slane %v1653_v37, 2 }
 0x29e   : > { %v1828_v32 = vadd.f32 %v1826_v46, %v1600_v34 }
 0x2a0   : > { %v1832_v17 = vadd.f32 %v1830_v29, %v1828_v32 }
 0x2a1   : > { %2181 = vmatmul.msk.f32.gmra.mxu1 %vm1570_vm11, %v1568_v14  ;;  %2185 = vmatmul.msk.f32.gmra.mxu2 %vm1570_vm11, %v1568_v14 }
 0x2a2   : > { %2189 = vmatmul.msk.f32.gmra.mxu3 %vm1570_vm11, %v1568_v14 }
 0x2a9   : > { %2182 = vmatmul.msk.f32.gmra.mxu1 %vm1570_vm11, %v1569_v13  ;;  %2186 = vmatmul.msk.f32.gmra.mxu2 %vm1570_vm11, %v1569_v13 }
 0x2aa   : > { %2190 = vmatmul.msk.f32.gmra.mxu3 %vm1570_vm11, %v1569_v13 }
 0x2c3   : > { %v1603_v54 = vpop.f32.mrf.mxu1 }
 0x2c9   : > { %v1629_v36 = vpop.f32.mrf.mxu2 }
 0x2ca   : > { %v1869_v7 = vrot.slane %v1629_v36, 1  ;;  %v1656_v38 = vpop.f32.mrf.mxu3 }
 0x2cb   : > { %v1874_v45 = vrot.slane %v1656_v38, 2 }
 0x2cc   : > { %v1870_v56 = vsel %vm822_vm4, %v1826_v46, %v1869_v7 }
 0x2cd   : > { %v1872_v22 = vadd.f32 %v1870_v56, %v1600_v34  ;;  %v1875_v26 = vsel %vm832_vm5, %v1830_v29, %v1874_v45  ;;  %v3598_v29 = vld [vmem:[#allocation43_spill] sm:$0xff] }
 0x2cf   : > { %v1877_v44 = vadd.f32 %v1875_v26, %v1872_v22 }
 0x2de   : > { %v1605_v3 = vpop.f32.mrf.mxu1 }
 0x2e4   : > { %v1632_v30 = vpop.f32.mrf.mxu2 }
 0x2e5   : > { %v1659_v5 = vpop.f32.mrf.mxu3 }
 0x2e6   : > { %v1607_v63 = vpop.f32.mrf.mxu1 }
 0x2ec   : > { %v1634_v9 = vpop.f32.mrf.mxu2 }
 0x2ed   : > { %v1661_v48 = vpop.f32.mrf.mxu3 }
 0x2ee   : > { %v1680_v27 = vpop.f32.mrf.mxu1  ;;  %v3599_v48 = vld [vmem:[#allocation52_spill] sm:$0xff] }
 0x2ef   : > { %v1834_v35 = vrot.slane %v1680_v27, 5 }
 0x2f1   : > { %v1836_v24 = vadd.f32 %v1834_v35, %v1832_v17  ;;  %v1864_v17 = vperm.slane %v3598_v29, 0 }
 0x2f4   : > { %v1707_v60 = vpop.f32.mrf.mxu2 }
 0x2f5   : > { %v1734_v15 = vpop.f32.mrf.mxu3  ;;  %v1839_v47 = vrot.slane %v1707_v60, 6 }
 0x2f6   : > { %v1683_v52 = vpop.f32.mrf.mxu1  ;;  %v1846_v0 = vrot.slane %v1734_v15, 7 }
 0x2f7   : > { %v1879_v42 = vrot.slane %v1683_v52, 5  ;;  %v3600_v52 = vld [vmem:[#allocation57_spill] sm:$0xff] }
 0x2f9   : > { %v1881_v41 = vadd.f32 %v1879_v42, %v1877_v44 }
 0x2fc   : > { %v1710_v12 = vpop.f32.mrf.mxu2 }
 0x2fd   : > { %v1737_v33 = vpop.f32.mrf.mxu3  ;;  %v1840_v61 = vrot.slane %v1710_v12, 6 }
 0x2fe   : > { %v1686_v28 = vpop.f32.mrf.mxu1  ;;  %v1847_v18 = vrot.slane %v1737_v33, 7 }
 0x2ff   : > { %v1841_v21 = vsel %vm313_vm1, %v1839_v47, %v1840_v61  ;;  %v1883_v10 = vadd.f32 %v1881_v41, %v1840_v61 }
 0x300   : > { %v1843_v49 = vadd.f32 %v1841_v21, %v1836_v24  ;;  %v1848_v51 = vsel %vm532_vm3, %v1846_v0, %v1847_v18 }
 0x301   : > { %v1885_v43 = vadd.f32 %v1883_v10, %v1847_v18 }
 0x302   : > { %v1850_v55 = vadd.f32 %v1848_v51, %v1843_v49 }
 0x304   : > { %v1713_v25 = vpop.f32.mrf.mxu2 }
 0x305   : > { %v1740_v11 = vpop.f32.mrf.mxu3 }
 0x306   : > { %v1688_v40 = vpop.f32.mrf.mxu1 }
 0x30c   : > { %v1715_v1 = vpop.f32.mrf.mxu2 }
 0x30d   : > { %v1742_v57 = vpop.f32.mrf.mxu3 }
 0x30e   : > { %v1761_v31 = vpop.f32.mrf.mxu1 }
 0x314   : > { %v1788_v2 = vpop.f32.mrf.mxu2 }
 0x315   : > { %v1815_v16 = vpop.f32.mrf.mxu3 }
 0x316   : > { %v1763_v53 = vpop.f32.mrf.mxu1 }
 0x317   : > { %v1852_v14 = vrot.slane %v1763_v53, 2 }
 0x319   : > { %v1854_v39 = vadd.f32 %v1852_v14, %v1850_v55 }
 0x31c   : > { %v1790_v59 = vpop.f32.mrf.mxu2 }
 0x31d   : > { %v1817_v13 = vpop.f32.mrf.mxu3  ;;  %v1856_v20 = vrot.slane %v1790_v59, 3 }
 0x31e   : > { %v1766_v58 = vpop.f32.mrf.mxu1  ;;  %v1860_v62 = vrot.slane %v1817_v13, 4 }
 0x31f   : > { %v1887_v8 = vrot.slane %v1766_v58, 2  ;;  %v1858_v23 = vadd.f32 %v1856_v20, %v1854_v39 }
 0x321   : > { %v1888_v50 = vsel %vm832_vm5, %v1852_v14, %v1887_v8  ;;  %v1862_v32 = vadd.f32 %v1860_v62, %v1858_v23 }
 0x322   : > { %v1890_v19 = vadd.f32 %v1888_v50, %v1885_v43 }
 0x323   : > { %v1866_v38 = vadd.f32 %v1864_v17, %v1862_v32 }
 0x324   : > { %v1793_v6 = vpop.f32.mrf.mxu2 }
 0x325   : > { %v1892_v46 = vrot.slane %v1793_v6, 3  ;;  %v1820_v37 = vpop.f32.mrf.mxu3  ;;  %v1867_v44 = vmax.f32 %v1866_v38, 0.0 }
 0x326   : > { %v1769_v34 = vpop.f32.mrf.mxu1  ;;  %v1896_v36 = vrot.slane %v1820_v37, 4 }
 0x327   : > { %v1894_v54 = vadd.f32 %v1892_v46, %v1890_v19 }
 0x329   : > { %v1898_v7 = vadd.f32 %v1896_v36, %v1894_v54 }
 0x32b   : > { %v1899_v45 = vadd.f32 %v1898_v7, %v1864_v17 }
 0x32c   : > { %v1796_v56 = vpop.f32.mrf.mxu2 }
 0x32d   : > { %v1900_v22 = vmax.f32 %v1899_v45, 0.0  ;;  %v1823_v26 = vpop.f32.mrf.mxu3 }
 0x32f   : > { %v1902_v3 = vrot.slane %v1900_v22, 5 }
 0x331   : > { %v1904_v30 = vmax.f32 %v1867_v44, %v1902_v3 }
 0x333   : > { %v1906_v5 = vrot.slane %v1904_v30, 1 }
 0x335   : > { %v1908_v63 = vmax.f32 %v1904_v30, %v1906_v5 }
 0x337   : > { %2191 = vmatmul.msk.f32.vlgmr.msra.gmra.mxu1 %vm1909_vm12, %v1908_v63 }
 0x3b4   : > { %v1930_v9 = vpop.f32.mrf.mxu1 }
 0x3b5   : > { %v1931_v27 = vadd.f32 %v1930_v9, %v3599_v48 }
 0x3b7   : > { %v1933_v60 = vmax.f32 %v1931_v27, 0.0 }
 0x3b9   : > { %2192 = vmatmul.msk.f32.vlgmr.msra.gmra.mxu2 %vm1570_vm11, %v1933_v60 }
 0x43c   : > { %v1954_v15 = vpop.f32.mrf.mxu2 }
 0x43d   : > { %v1955_v12 = vadd.f32 %v1954_v15, %v3600_v52 }
 0x43f   : > { %v1958_v33 = vsel %vm1957_vm13, %v1955_v12, -inf }
 0x440   : > { %1959 = vmax.xlane.f32.xlu0 %v1958_v33 }
 0x4b3   : > { %v1960_v28 = vpop.xlane.xlu0 %1959 }
 0x4b4   : > { %v1961_v25 = vsub.f32 %v1955_v12, %v1960_v28 }
 0x4b6   : > { %v1962_v11 = vmul.f32 1.442695, %v1961_v25 }
 0x4b8   : > { %2204 = vpow2.f32 %v1962_v11 }
 0x4be   : > { %v2205_v40 = vpop.eup %2204 }
 0x4bf   : > { %v1964_v1 = vsel %vm1957_vm13, %v2205_v40, 0.0 }
 0x4c0   : > { %1965 = vadd.xlane.f32.xlu0 %v1964_v1 }
 0x533   : > { %v1966_v57 = vpop.xlane.xlu0 %1965 }
 0x534   : > { %2206 = vlog2.f32 %v1966_v57 }
 0x53a   : > { %v2207_v31 = vpop.eup %2206 }
 0x53b   : > { %v1968_v61 = vmul.f32 0.6931472, %v2207_v31  ;;  %92 = sbr.rel (!%p90_p0) target bundleno = 57 (0x39), region = 65 }
 0x53d   : > { %v1969_v2 = vsub.f32 %v1961_v25, %v1968_v61 }
 0x53f   : > { %1971 = vst.msk [vmem:[%s1970_s3] sm:$0x1] %vm1957_vm13, %v1969_v2 }

</bundles_post_ra>
